<compile_context>
chip_gen: v7x
topology: tpu7x:2x2x1
jax: 0.10.0
libtpu: 0.0.40
codegen_flags: <defaults>
</compile_context>

<pallas_src>
import functools

import jax
import jax.numpy as jnp
import numpy as np
from jax import lax
from jax.experimental import pallas as pl
from jax.experimental.pallas import tpu as pltpu


# ---------------------------------------------------------------------------
# Pallas kernels
# ---------------------------------------------------------------------------

def _matmul_kernel(a_ref, b_ref, o_ref, acc_ref):
    """Canonical tiled matmul with a VMEM f32 accumulator (K axis = grid axis 2)."""
    @pl.when(pl.program_id(2) == 0)
    def _():
        acc_ref[...] = jnp.zeros_like(acc_ref)

    acc_ref[...] += jnp.dot(a_ref[...], b_ref[...],
                            preferred_element_type=jnp.float32)

    @pl.when(pl.program_id(2) == pl.num_programs(2) - 1)
    def _():
        o_ref[...] = acc_ref[...].astype(o_ref.dtype)


def _apply_act(y, act, slope):
    if act == "relu":
        return jnp.maximum(y, jnp.asarray(0.0, y.dtype))
    if act in ("leakyrelu", "prelu"):
        return jnp.where(y >= 0, y, y * jnp.asarray(slope, y.dtype))
    return y  # "linear"


def _affine_act_kernel(x_ref, s_ref, t_ref, o_ref, *, act, slope):
    # x_ref: (C, TD); s_ref/t_ref: (C, 1) broadcast along the lane-dense axis.
    y = x_ref[...] * s_ref[...] + t_ref[...]
    o_ref[...] = _apply_act(y, act, slope).astype(o_ref.dtype)


def _affine_act_res_kernel(x_ref, s_ref, t_ref, r_ref, o_ref, *, act, slope):
    y = x_ref[...] * s_ref[...] + t_ref[...]
    o_ref[...] = (_apply_act(y, act, slope) + r_ref[...]).astype(o_ref.dtype)


# ---------------------------------------------------------------------------
# Pallas wrappers
# ---------------------------------------------------------------------------

def _pallas_matmul(a, b, *, tm=128, tk=128, tn=128):
    """C = A @ B (f32 accumulate). A:(M,K), B:(K,N); zero-padded to tile multiples."""
    m, k = a.shape
    k2, n = b.shape
    assert k == k2
    m_pad = ((m + tm - 1) // tm) * tm
    k_pad = ((k + tk - 1) // tk) * tk
    n_pad = ((n + tn - 1) // tn) * tn
    a_p = jnp.pad(a, ((0, m_pad - m), (0, k_pad - k)))
    b_p = jnp.pad(b, ((0, k_pad - k), (0, n_pad - n)))

    out = pl.pallas_call(
        _matmul_kernel,
        out_shape=jax.ShapeDtypeStruct((m_pad, n_pad), jnp.float32),
        grid_spec=pltpu.PrefetchScalarGridSpec(
            num_scalar_prefetch=0,
            grid=(m_pad // tm, n_pad // tn, k_pad // tk),
            in_specs=[
                pl.BlockSpec((tm, tk), lambda i, j, kk: (i, kk)),
                pl.BlockSpec((tk, tn), lambda i, j, kk: (kk, j)),
            ],
            out_specs=pl.BlockSpec((tm, tn), lambda i, j, kk: (i, j)),
            scratch_shapes=[pltpu.VMEM((tm, tn), jnp.float32)],
        ),
        compiler_params=pltpu.CompilerParams(
            dimension_semantics=("parallel", "parallel", "arbitrary"),
        ),
    )(a_p, b_p)
    return out[:m, :n]


def _spatial_tile(dhw, nchan, itemsize, budget_bytes=2 * 1024 * 1024):
    """Largest lane-aligned spatial tile with a per-operand block <= ~2 MiB."""
    if dhw <= 128 or dhw % 128 != 0:
        return dhw  # full-extent block (always legal)
    max_td = max(128, budget_bytes // max(1, nchan * itemsize))
    td = min(dhw, (max_td // 128) * 128)
    while dhw % td != 0:
        td -= 128
    return td


def _pointwise_affine_act(x, scale, shift, *, act, slope, residual=None):
    """y = act(x * scale + shift) (+ residual). x:(N,C,D,H,W); scale/shift:(N,C,1)."""
    n, c, d, h, w = x.shape
    dhw = d * h * w
    x3 = x.reshape(n, c, dhw)
    td = _spatial_tile(dhw, c, x3.dtype.itemsize)
    grid = (n, dhw // td)

    big_spec = pl.BlockSpec((None, c, td), lambda i, s: (i, 0, s))
    small_spec = pl.BlockSpec((None, c, 1), lambda i, s: (i, 0, 0))

    scale3 = scale.astype(x3.dtype)
    shift3 = shift.astype(x3.dtype)

    if residual is None:
        kernel = functools.partial(_affine_act_kernel, act=act, slope=slope)
        in_specs = [big_spec, small_spec, small_spec]
        args = (x3, scale3, shift3)
    else:
        r3 = residual.reshape(n, c, dhw).astype(x3.dtype)
        kernel = functools.partial(_affine_act_res_kernel, act=act, slope=slope)
        in_specs = [big_spec, small_spec, small_spec, big_spec]
        args = (x3, scale3, shift3, r3)

    out3 = pl.pallas_call(
        kernel,
        out_shape=jax.ShapeDtypeStruct((n, c, dhw), x3.dtype),
        grid_spec=pltpu.PrefetchScalarGridSpec(
            num_scalar_prefetch=0,
            grid=grid,
            in_specs=in_specs,
            out_specs=big_spec,
        ),
        compiler_params=pltpu.CompilerParams(
            dimension_semantics=("parallel", "parallel"),
        ),
    )(*args)
    return out3.reshape(n, c, d, h, w)


def _conv3d(x, w, *, stride=(1, 1, 1), padding=(0, 0, 0), dilation=(1, 1, 1)):
    """3-D cross-correlation (no bias) via im2col + Pallas tiled matmul.

    Patch extraction is wrapper-side data movement (pad + strided slices); the MACs
    run on the MXU inside the Pallas matmul kernel.
    """
    # TODO(synk): im2col is wrapper-side layout plumbing; a fully fused Pallas conv3d
    #             would stream taps from HBM instead of materializing patches.
    n, cin, d, h, wd = x.shape
    cout, cin2, kd, kh, kw = w.shape
    assert cin == cin2
    sd, sh, sw = stride
    pd, ph, pw = padding
    dd, dh, dw = dilation

    od = (d + 2 * pd - dd * (kd - 1) - 1) // sd + 1
    oh = (h + 2 * ph - dh * (kh - 1) - 1) // sh + 1
    ow = (wd + 2 * pw - dw * (kw - 1) - 1) // sw + 1

    xp = jnp.pad(x, ((0, 0), (0, 0), (pd, pd), (ph, ph), (pw, pw)))
    taps = []
    for a in range(kd):
        for b in range(kh):
            for c in range(kw):
                d0, h0, w0 = a * dd, b * dh, c * dw
                taps.append(
                    xp[:, :,
                       d0:d0 + (od - 1) * sd + 1:sd,
                       h0:h0 + (oh - 1) * sh + 1:sh,
                       w0:w0 + (ow - 1) * sw + 1:sw])
    kvol = kd * kh * kw
    p = jnp.stack(taps, axis=0)                 # (kvol, N, Cin, od, oh, ow)
    p = p.transpose(1, 3, 4, 5, 2, 0)           # (N, od, oh, ow, Cin, kvol)
    a_mat = p.reshape(n * od * oh * ow, cin * kvol)
    b_mat = w.reshape(cout, cin * kvol).T.astype(a_mat.dtype)

    out = _pallas_matmul(a_mat, b_mat)          # (M, Cout) f32
    return out.reshape(n, od, oh, ow, cout).transpose(0, 4, 1, 2, 3)


def _bn_scale_shift(x, gamma, beta, eps=1e-5):
    """Training-mode BatchNorm3d folded into a per-channel affine (batch statistics)."""
    # TODO(synk): the batch mean/var reduction stays in jnp (tiny); could be a Pallas
    #             reduction kernel.
    mean = jnp.mean(x, axis=(0, 2, 3, 4))
    var = jnp.var(x, axis=(0, 2, 3, 4))           # biased, matches PyTorch training BN
    scale = gamma * lax.rsqrt(var + eps)
    shift = beta - mean * scale
    return scale, shift


# ---------------------------------------------------------------------------
# DownTransition module (forward only, nn.Module defaults: training mode)
# ---------------------------------------------------------------------------

class DownTransition:
    def __init__(self, in_chans, out_chans, relu_type, do_rate, n_convs, *, key):
        assert n_convs in (2, 3)
        assert out_chans == 2 * in_chans, "residual add requires outChans == 2*inChans"
        self.in_chans, self.out_chans = in_chans, out_chans
        self.n_convs = n_convs
        self.do_rate = float(do_rate)
        self.act = relu_type if relu_type in ("relu", "leakyrelu", "prelu") else "relu"
        self.slope = {"relu": 0.0, "leakyrelu": 0.1, "prelu": 0.25}[self.act]
        self.eps = 1e-5

        def conv_init(k, shape):
            fan_in = shape[1] * shape[2] * shape[3] * shape[4]
            return jax.random.normal(k, shape, jnp.float32) / np.sqrt(fan_in)

        keys = iter(jax.random.split(key, 16))
        self.w_in = conv_init(next(keys), (out_chans, in_chans, 5, 5, 5))
        self.b_in = 0.1 * jax.random.normal(next(keys), (out_chans,), jnp.float32)
        self.loop = []
        for j in range(n_convs):
            w = conv_init(next(keys), (out_chans, out_chans, 3, 3, 3))
            b = 0.1 * jax.random.normal(next(keys), (out_chans,), jnp.float32)
            self.loop.append((w, b, (1, j + 1, j + 1)))  # padding == dilation
        self.w_cat = conv_init(next(keys), (out_chans, n_convs * out_chans, 3, 3, 3))
        self.b_cat = 0.1 * jax.random.normal(next(keys), (out_chans,), jnp.float32)
        self.w_down = conv_init(next(keys), (out_chans, out_chans, 2, 2, 2))
        self.b_down = 0.1 * jax.random.normal(next(keys), (out_chans,), jnp.float32)
        # BatchNorm3d affine params at module init: gamma = 1, beta = 0.
        self.gamma = jnp.ones((out_chans,), jnp.float32)
        self.beta = jnp.zeros((out_chans,), jnp.float32)

    def _conv_bn_act(self, x, w, b, pad, dil, need_bnorm, residual=None):
        mm = _conv3d(x, w, padding=pad, dilation=dil)
        n, c = mm.shape[0], mm.shape[1]
        if need_bnorm:
            # Conv bias cancels exactly inside training-mode BN, so stats on `mm` suffice.
            scale, shift = _bn_scale_shift(mm, self.gamma, self.beta, self.eps)
        else:
            scale, shift = jnp.ones((c,), jnp.float32), b
        return _pointwise_affine_act(
            mm,
            jnp.broadcast_to(scale[None, :, None], (n, c, 1)),
            jnp.broadcast_to(shift[None, :, None], (n, c, 1)),
            act=self.act, slope=self.slope, residual=residual)

    def __call__(self, x, need_bnorm=True, do_need=True, *, dropout_factor=None, key=None):
        n, c = x.shape[0], self.out_chans

        # downInputConv -> (BN) -> act
        inp = self._conv_bn_act(x, self.w_in, self.b_in, (2, 2, 2), (1, 1, 1), need_bnorm)

        # dilated branch convs -> (BN) -> act, concat, cat-conv -> BN -> act, + residual
        branches = [self._conv_bn_act(inp, w, b, pdil, pdil, need_bnorm)
                    for (w, b, pdil) in self.loop]
        combine = jnp.concatenate(branches, axis=1)
        residual = jnp.concatenate([x, x], axis=1)        # torch.cat([x] * 2, 1)
        add_down = self._conv_bn_act(combine, self.w_cat, self.b_cat, (1, 1, 1), (1, 1, 1),
                                     need_bnorm, residual=residual)

        # downConv (k=2, stride 2) -> act -> (BN) -> (Dropout3d)
        mm = _conv3d(add_down, self.w_down, stride=(2, 2, 2))
        ones = jnp.ones((c,), jnp.float32)
        y = _pointwise_affine_act(
            mm,
            jnp.broadcast_to(ones[None, :, None], (n, c, 1)),
            jnp.broadcast_to(self.b_down[None, :, None], (n, c, 1)),
            act=self.act, slope=self.slope)

        if need_bnorm:
            scale, shift = _bn_scale_shift(y, self.gamma, self.beta, self.eps)
        else:
            scale, shift = ones, jnp.zeros((c,), jnp.float32)

        if do_need:
            if dropout_factor is None:
                key = jax.random.PRNGKey(0) if key is None else key
                if self.do_rate >= 1.0:
                    dropout_factor = jnp.zeros((n, c), jnp.float32)
                else:
                    keep = jax.random.bernoulli(key, 1.0 - self.do_rate, (n, c))
                    dropout_factor = keep.astype(jnp.float32) / (1.0 - self.do_rate)
        else:
            dropout_factor = jnp.ones((n, c), jnp.float32)

        # Fold BN affine + channel-dropout scaling into one per-(n, c) affine kernel.
        tot_scale = (scale[None, :] * dropout_factor)[:, :, None]
        tot_shift = (shift[None, :] * dropout_factor)[:, :, None]
        downsample = _pointwise_affine_act(y, tot_scale, tot_shift, act="linear", slope=0.0)

        return downsample, add_down


# ---------------------------------------------------------------------------
# Pure-JAX reference (for correctness check only)
# ---------------------------------------------------------------------------

def _ref_conv3d(x, w, b, *, stride=(1, 1, 1), padding=(0, 0, 0), dilation=(1, 1, 1)):
    dn = lax.conv_dimension_numbers(x.shape, w.shape, ("NCDHW", "OIDHW", "NCDHW"))
    out = lax.conv_general_dilated(
        x, w, window_strides=stride, padding=[(p, p) for p in padding],
        rhs_dilation=dilation, dimension_numbers=dn, precision=lax.Precision.HIGHEST)
    return out + b[None, :, None, None, None]


def _ref_bn(x, gamma, beta, eps=1e-5):
    mean = jnp.mean(x, axis=(0, 2, 3, 4), keepdims=True)
    var = jnp.var(x, axis=(0, 2, 3, 4), keepdims=True)
    return ((x - mean) * lax.rsqrt(var + eps) * gamma[None, :, None, None, None]
            + beta[None, :, None, None, None])


def _ref_act(x, act, slope):
    if act == "relu":
        return jnp.maximum(x, 0.0)
    if act in ("leakyrelu", "prelu"):
        return jnp.where(x >= 0, x, slope * x)
    return x


def _ref_down_transition(mod, x, dropout_factor):
    def cba(t, w, b, pad, dil):
        t = _ref_conv3d(t, w, b, padding=pad, dilation=dil)
        t = _ref_bn(t, mod.gamma, mod.beta, mod.eps)
        return _ref_act(t, mod.act, mod.slope)

    inp = cba(x, mod.w_in, mod.b_in, (2, 2, 2), (1, 1, 1))
    branches = [cba(inp, w, b, pdil, pdil) for (w, b, pdil) in mod.loop]
    combine = jnp.concatenate(branches, axis=1)
    cat = cba(combine, mod.w_cat, mod.b_cat, (1, 1, 1), (1, 1, 1))
    add_down = cat + jnp.concatenate([x, x], axis=1)
    ds = _ref_conv3d(add_down, mod.w_down, mod.b_down, stride=(2, 2, 2))
    ds = _ref_act(ds, mod.act, mod.slope)
    ds = _ref_bn(ds, mod.gamma, mod.beta, mod.eps)
    ds = ds * dropout_factor[:, :, None, None, None]
    return ds, add_down


# ---------------------------------------------------------------------------
# Demo / self-check
# ---------------------------------------------------------------------------

if __name__ == "__main__":
    key = jax.random.PRNGKey(0)
    k_x, k_params, k_drop = jax.random.split(key, 3)

    N, IN_CH, OUT_CH, D, H, W = 2, 2, 4, 8, 8, 8
    x = jax.random.normal(k_x, (N, IN_CH, D, H, W), jnp.float32)

    mod = DownTransition(IN_CH, OUT_CH, "prelu", 0.3, 2, key=k_params)

    # Deterministic Dropout3d channel mask, shared with the reference.
    keep = jax.random.bernoulli(k_drop, 1.0 - mod.do_rate, (N, OUT_CH))
    factor = keep.astype(jnp.float32) / (1.0 - mod.do_rate)

    fwd = jax.jit(lambda x_, f_: mod(x_, dropout_factor=f_))
    down, add_down = fwd(x, factor)
    down = jax.block_until_ready(down)
    add_down = jax.block_until_ready(add_down)

    assert down.shape == (N, OUT_CH, D // 2, H // 2, W // 2)
    assert add_down.shape == (N, OUT_CH, D, H, W)
    assert down.dtype == jnp.float32 and add_down.dtype == jnp.float32

    ref_down, ref_add = _ref_down_transition(mod, x, factor)
    np.testing.assert_allclose(np.asarray(add_down), np.asarray(ref_add),
                               rtol=2e-3, atol=2e-3)
    np.testing.assert_allclose(np.asarray(down), np.asarray(ref_down),
                               rtol=2e-3, atol=2e-3)

    print("KERNEL_OK")
</pallas_src>

<mosaic_0001>
module attributes {stable_mosaic.version = 11 : i64} {
  func.func @_matmul_kernel(%arg0: i32, %arg1: i32, %arg2: i32, %arg3: memref<128x128xf32, #tpu.memory_space<vmem>>, %arg4: memref<128x128xf32, #tpu.memory_space<vmem>>, %arg5: memref<128x128xf32, #tpu.memory_space<vmem>>, %arg6: memref<128x128xf32, #tpu.memory_space<vmem>>) attributes {dimension_semantics = [#tpu.dimension_semantics<parallel>, #tpu.dimension_semantics<parallel>, #tpu.dimension_semantics<arbitrary>], iteration_bounds = array<i64: 8, 1, 2>, scalar_prefetch = 0 : i64, scratch_operands = 1 : i64, tpu.core_type = #tpu.core_type<tc>, window_params = [{transform_indices = @transform_0, window_bounds = array<i64: 128, 128>}, {transform_indices = @transform_1, window_bounds = array<i64: 128, 128>}, {transform_indices = @transform_2, window_bounds = array<i64: 128, 128>}]} {
    %c0_i32 = arith.constant 0 : i32
    %0 = arith.cmpi eq, %arg2, %c0_i32 : i32
    %1 = arith.extui %0 : i1 to i32
    %c0_i32_0 = arith.constant 0 : i32
    %2 = arith.cmpi ne, %1, %c0_i32_0 : i32
    scf.if %2 {
      %cst_9 = arith.constant 0.000000e+00 : f32
      %12 = vector.broadcast %cst_9 : f32 to vector<128x128xf32>
      %c0_10 = arith.constant 0 : index
      %c0_11 = arith.constant 0 : index
      %13 = vector.load %arg6[%c0_10, %c0_11] : memref<128x128xf32, #tpu.memory_space<vmem>>, vector<128x128xf32>
      tpu.vector_store %arg6[%c0_10, %c0_11], %12 {strides = array<i32>} : memref<128x128xf32, #tpu.memory_space<vmem>>, vector<128x128xf32>,
    } else {
    }
    %c0 = arith.constant 0 : index
    %c0_1 = arith.constant 0 : index
    %3 = vector.load %arg6[%c0, %c0_1] : memref<128x128xf32, #tpu.memory_space<vmem>>, vector<128x128xf32>
    %c0_2 = arith.constant 0 : index
    %c0_3 = arith.constant 0 : index
    %4 = vector.load %arg3[%c0_2, %c0_3] : memref<128x128xf32, #tpu.memory_space<vmem>>, vector<128x128xf32>
    %c0_4 = arith.constant 0 : index
    %c0_5 = arith.constant 0 : index
    %5 = vector.load %arg4[%c0_4, %c0_5] : memref<128x128xf32, #tpu.memory_space<vmem>>, vector<128x128xf32>
    %cst = arith.constant dense<0.000000e+00> : vector<128x128xf32>
    %6 = tpu.matmul %4, %5, %cst {dimension_numbers = #tpu.dot_dimension_numbers<[1], [0], [0], [1], [0, 0, 1, 1], [], []>} : vector<128x128xf32>, vector<128x128xf32>, vector<128x128xf32> -> vector<128x128xf32>
    %7 = arith.addf %3, %6 : vector<128x128xf32>
    %c0_6 = arith.constant 0 : index
    %c0_7 = arith.constant 0 : index
    %8 = vector.load %arg6[%c0_6, %c0_7] : memref<128x128xf32, #tpu.memory_space<vmem>>, vector<128x128xf32>
    tpu.vector_store %arg6[%c0_6, %c0_7], %7 {strides = array<i32>} : memref<128x128xf32, #tpu.memory_space<vmem>>, vector<128x128xf32>,
    %c1_i32 = arith.constant 1 : i32
    %9 = arith.cmpi eq, %arg2, %c1_i32 : i32
    %10 = arith.extui %9 : i1 to i32
    %c0_i32_8 = arith.constant 0 : i32
    %11 = arith.cmpi ne, %10, %c0_i32_8 : i32
    scf.if %11 {
      %c0_9 = arith.constant 0 : index
      %c0_10 = arith.constant 0 : index
      %12 = vector.load %arg6[%c0_9, %c0_10] : memref<128x128xf32, #tpu.memory_space<vmem>>, vector<128x128xf32>
      %c0_11 = arith.constant 0 : index
      %c0_12 = arith.constant 0 : index
      %13 = vector.load %arg5[%c0_11, %c0_12] : memref<128x128xf32, #tpu.memory_space<vmem>>, vector<128x128xf32>
      tpu.vector_store %arg5[%c0_11, %c0_12], %12 {strides = array<i32>} : memref<128x128xf32, #tpu.memory_space<vmem>>, vector<128x128xf32>,
    } else {
    }
    return
  }
  func.func @transform_0(%arg0: i32, %arg1: i32, %arg2: i32) -> (i32, i32) {
    %c0_i32 = arith.constant 0 : i32
    return %arg0, %arg2 : i32, i32
  }
  func.func @transform_1(%arg0: i32, %arg1: i32, %arg2: i32) -> (i32, i32) {
    %c0_i32 = arith.constant 0 : i32
    return %arg2, %arg1 : i32, i32
  }
  func.func @transform_2(%arg0: i32, %arg1: i32, %arg2: i32) -> (i32, i32) {
    %c0_i32 = arith.constant 0 : i32
    return %arg0, %arg1 : i32, i32
  }
}

module attributes {stable_mosaic.version = 11 : i64} {
  func.func @_affine_act_kernel(%arg0: i32, %arg1: i32, %arg2: memref<1x4x512xf32, #tpu.memory_space<vmem>>, %arg3: memref<1x4x1xf32, #tpu.memory_space<vmem>>, %arg4: memref<1x4x1xf32, #tpu.memory_space<vmem>>, %arg5: memref<1x4x512xf32, #tpu.memory_space<vmem>>) attributes {dimension_semantics = [#tpu.dimension_semantics<parallel>, #tpu.dimension_semantics<parallel>], iteration_bounds = array<i64: 2, 1>, scalar_prefetch = 0 : i64, scratch_operands = 0 : i64, tpu.core_type = #tpu.core_type<tc>, window_params = [{transform_indices = @transform_0, window_bounds = array<i64: 1, 4, 512>}, {transform_indices = @transform_1, window_bounds = array<i64: 1, 4, 1>}, {transform_indices = @transform_2, window_bounds = array<i64: 1, 4, 1>}, {transform_indices = @transform_3, window_bounds = array<i64: 1, 4, 512>}]} {
    %c0 = arith.constant 0 : index
    %c0_0 = arith.constant 0 : index
    %c0_1 = arith.constant 0 : index
    %0 = vector.load %arg2[%c0, %c0_0, %c0_1] : memref<1x4x512xf32, #tpu.memory_space<vmem>>, vector<1x4x512xf32>
    %1 = vector.shape_cast %0 : vector<1x4x512xf32> to vector<4x512xf32>
    %c0_2 = arith.constant 0 : index
    %c0_3 = arith.constant 0 : index
    %c0_4 = arith.constant 0 : index
    %2 = vector.load %arg3[%c0_2, %c0_3, %c0_4] : memref<1x4x1xf32, #tpu.memory_space<vmem>>, vector<1x4x1xf32>
    %3 = vector.shape_cast %2 : vector<1x4x1xf32> to vector<4x1xf32>
    %4 = vector.broadcast %3 : vector<4x1xf32> to vector<4x512xf32>
    %5 = arith.mulf %1, %4 : vector<4x512xf32>
    %c0_5 = arith.constant 0 : index
    %c0_6 = arith.constant 0 : index
    %c0_7 = arith.constant 0 : index
    %6 = vector.load %arg4[%c0_5, %c0_6, %c0_7] : memref<1x4x1xf32, #tpu.memory_space<vmem>>, vector<1x4x1xf32>
    %7 = vector.shape_cast %6 : vector<1x4x1xf32> to vector<4x1xf32>
    %8 = vector.broadcast %7 : vector<4x1xf32> to vector<4x512xf32>
    %9 = arith.addf %5, %8 : vector<4x512xf32>
    %cst = arith.constant 0.000000e+00 : f32
    %10 = vector.broadcast %cst : f32 to vector<4x512xf32>
    %11 = arith.cmpf oge, %9, %10 : vector<4x512xf32>
    %cst_8 = arith.constant 2.500000e-01 : f32
    %12 = vector.broadcast %cst_8 : f32 to vector<4x512xf32>
    %13 = arith.mulf %9, %12 : vector<4x512xf32>
    %14 = arith.select %11, %9, %13 : vector<4x512xi1>, vector<4x512xf32>
    %c0_9 = arith.constant 0 : index
    %c0_10 = arith.constant 0 : index
    %c0_11 = arith.constant 0 : index
    %15 = vector.load %arg5[%c0_9, %c0_10, %c0_11] : memref<1x4x512xf32, #tpu.memory_space<vmem>>, vector<1x4x512xf32>
    %16 = vector.shape_cast %15 : vector<1x4x512xf32> to vector<4x512xf32>
    %17 = vector.shape_cast %14 : vector<4x512xf32> to vector<1x4x512xf32>
    tpu.vector_store %arg5[%c0_9, %c0_10, %c0_11], %17 {strides = array<i32>} : memref<1x4x512xf32, #tpu.memory_space<vmem>>, vector<1x4x512xf32>,
    return
  }
  func.func @transform_0(%arg0: i32, %arg1: i32) -> (i32, i32, i32) {
    %c0_i32 = arith.constant 0 : i32
    %c0_i32_0 = arith.constant 0 : i32
    return %arg0, %c0_i32, %arg1 : i32, i32, i32
  }
  func.func @transform_1(%arg0: i32, %arg1: i32) -> (i32, i32, i32) {
    %c0_i32 = arith.constant 0 : i32
    %c0_i32_0 = arith.constant 0 : i32
    %c0_i32_1 = arith.constant 0 : i32
    return %arg0, %c0_i32, %c0_i32_0 : i32, i32, i32
  }
  func.func @transform_2(%arg0: i32, %arg1: i32) -> (i32, i32, i32) {
    %c0_i32 = arith.constant 0 : i32
    %c0_i32_0 = arith.constant 0 : i32
    %c0_i32_1 = arith.constant 0 : i32
    return %arg0, %c0_i32, %c0_i32_0 : i32, i32, i32
  }
  func.func @transform_3(%arg0: i32, %arg1: i32) -> (i32, i32, i32) {
    %c0_i32 = arith.constant 0 : i32
    %c0_i32_0 = arith.constant 0 : i32
    return %arg0, %c0_i32, %arg1 : i32, i32, i32
  }
}

module attributes {stable_mosaic.version = 11 : i64} {
  func.func @_matmul_kernel(%arg0: i32, %arg1: i32, %arg2: i32, %arg3: memref<128x128xf32, #tpu.memory_space<vmem>>, %arg4: memref<128x128xf32, #tpu.memory_space<vmem>>, %arg5: memref<128x128xf32, #tpu.memory_space<vmem>>, %arg6: memref<128x128xf32, #tpu.memory_space<vmem>>) attributes {dimension_semantics = [#tpu.dimension_semantics<parallel>, #tpu.dimension_semantics<parallel>, #tpu.dimension_semantics<arbitrary>], iteration_bounds = array<i64: 8, 1, 1>, scalar_prefetch = 0 : i64, scratch_operands = 1 : i64, tpu.core_type = #tpu.core_type<tc>, window_params = [{transform_indices = @transform_0, window_bounds = array<i64: 128, 128>}, {transform_indices = @transform_1, window_bounds = array<i64: 128, 128>}, {transform_indices = @transform_2, window_bounds = array<i64: 128, 128>}]} {
    %c0_i32 = arith.constant 0 : i32
    %0 = arith.cmpi eq, %arg2, %c0_i32 : i32
    %1 = arith.extui %0 : i1 to i32
    %c0_i32_0 = arith.constant 0 : i32
    %2 = arith.cmpi ne, %1, %c0_i32_0 : i32
    scf.if %2 {
      %cst_10 = arith.constant 0.000000e+00 : f32
      %12 = vector.broadcast %cst_10 : f32 to vector<128x128xf32>
      %c0_11 = arith.constant 0 : index
      %c0_12 = arith.constant 0 : index
      %13 = vector.load %arg6[%c0_11, %c0_12] : memref<128x128xf32, #tpu.memory_space<vmem>>, vector<128x128xf32>
      tpu.vector_store %arg6[%c0_11, %c0_12], %12 {strides = array<i32>} : memref<128x128xf32, #tpu.memory_space<vmem>>, vector<128x128xf32>,
    } else {
    }
    %c0 = arith.constant 0 : index
    %c0_1 = arith.constant 0 : index
    %3 = vector.load %arg6[%c0, %c0_1] : memref<128x128xf32, #tpu.memory_space<vmem>>, vector<128x128xf32>
    %c0_2 = arith.constant 0 : index
    %c0_3 = arith.constant 0 : index
    %4 = vector.load %arg3[%c0_2, %c0_3] : memref<128x128xf32, #tpu.memory_space<vmem>>, vector<128x128xf32>
    %c0_4 = arith.constant 0 : index
    %c0_5 = arith.constant 0 : index
    %5 = vector.load %arg4[%c0_4, %c0_5] : memref<128x128xf32, #tpu.memory_space<vmem>>, vector<128x128xf32>
    %cst = arith.constant dense<0.000000e+00> : vector<128x128xf32>
    %6 = tpu.matmul %4, %5, %cst {dimension_numbers = #tpu.dot_dimension_numbers<[1], [0], [0], [1], [0, 0, 1, 1], [], []>} : vector<128x128xf32>, vector<128x128xf32>, vector<128x128xf32> -> vector<128x128xf32>
    %7 = arith.addf %3, %6 : vector<128x128xf32>
    %c0_6 = arith.constant 0 : index
    %c0_7 = arith.constant 0 : index
    %8 = vector.load %arg6[%c0_6, %c0_7] : memref<128x128xf32, #tpu.memory_space<vmem>>, vector<128x128xf32>
    tpu.vector_store %arg6[%c0_6, %c0_7], %7 {strides = array<i32>} : memref<128x128xf32, #tpu.memory_space<vmem>>, vector<128x128xf32>,
    %c0_i32_8 = arith.constant 0 : i32
    %9 = arith.cmpi eq, %arg2, %c0_i32_8 : i32
    %10 = arith.extui %9 : i1 to i32
    %c0_i32_9 = arith.constant 0 : i32
    %11 = arith.cmpi ne, %10, %c0_i32_9 : i32
    scf.if %11 {
      %c0_10 = arith.constant 0 : index
      %c0_11 = arith.constant 0 : index
      %12 = vector.load %arg6[%c0_10, %c0_11] : memref<128x128xf32, #tpu.memory_space<vmem>>, vector<128x128xf32>
      %c0_12 = arith.constant 0 : index
      %c0_13 = arith.constant 0 : index
      %13 = vector.load %arg5[%c0_12, %c0_13] : memref<128x128xf32, #tpu.memory_space<vmem>>, vector<128x128xf32>
      tpu.vector_store %arg5[%c0_12, %c0_13], %12 {strides = array<i32>} : memref<128x128xf32, #tpu.memory_space<vmem>>, vector<128x128xf32>,
    } else {
    }
    return
  }
  func.func @transform_0(%arg0: i32, %arg1: i32, %arg2: i32) -> (i32, i32) {
    %c0_i32 = arith.constant 0 : i32
    return %arg0, %arg2 : i32, i32
  }
  func.func @transform_1(%arg0: i32, %arg1: i32, %arg2: i32) -> (i32, i32) {
    %c0_i32 = arith.constant 0 : i32
    return %arg2, %arg1 : i32, i32
  }
  func.func @transform_2(%arg0: i32, %arg1: i32, %arg2: i32) -> (i32, i32) {
    %c0_i32 = arith.constant 0 : i32
    return %arg0, %arg1 : i32, i32
  }
}

module attributes {stable_mosaic.version = 11 : i64} {
  func.func @_matmul_kernel(%arg0: i32, %arg1: i32, %arg2: i32, %arg3: memref<128x128xf32, #tpu.memory_space<vmem>>, %arg4: memref<128x128xf32, #tpu.memory_space<vmem>>, %arg5: memref<128x128xf32, #tpu.memory_space<vmem>>, %arg6: memref<128x128xf32, #tpu.memory_space<vmem>>) attributes {dimension_semantics = [#tpu.dimension_semantics<parallel>, #tpu.dimension_semantics<parallel>, #tpu.dimension_semantics<arbitrary>], iteration_bounds = array<i64: 8, 1, 1>, scalar_prefetch = 0 : i64, scratch_operands = 1 : i64, tpu.core_type = #tpu.core_type<tc>, window_params = [{transform_indices = @transform_0, window_bounds = array<i64: 128, 128>}, {transform_indices = @transform_1, window_bounds = array<i64: 128, 128>}, {transform_indices = @transform_2, window_bounds = array<i64: 128, 128>}]} {
    %c0_i32 = arith.constant 0 : i32
    %0 = arith.cmpi eq, %arg2, %c0_i32 : i32
    %1 = arith.extui %0 : i1 to i32
    %c0_i32_0 = arith.constant 0 : i32
    %2 = arith.cmpi ne, %1, %c0_i32_0 : i32
    scf.if %2 {
      %cst_10 = arith.constant 0.000000e+00 : f32
      %12 = vector.broadcast %cst_10 : f32 to vector<128x128xf32>
      %c0_11 = arith.constant 0 : index
      %c0_12 = arith.constant 0 : index
      %13 = vector.load %arg6[%c0_11, %c0_12] : memref<128x128xf32, #tpu.memory_space<vmem>>, vector<128x128xf32>
      tpu.vector_store %arg6[%c0_11, %c0_12], %12 {strides = array<i32>} : memref<128x128xf32, #tpu.memory_space<vmem>>, vector<128x128xf32>,
    } else {
    }
    %c0 = arith.constant 0 : index
    %c0_1 = arith.constant 0 : index
    %3 = vector.load %arg6[%c0, %c0_1] : memref<128x128xf32, #tpu.memory_space<vmem>>, vector<128x128xf32>
    %c0_2 = arith.constant 0 : index
    %c0_3 = arith.constant 0 : index
    %4 = vector.load %arg3[%c0_2, %c0_3] : memref<128x128xf32, #tpu.memory_space<vmem>>, vector<128x128xf32>
    %c0_4 = arith.constant 0 : index
    %c0_5 = arith.constant 0 : index
    %5 = vector.load %arg4[%c0_4, %c0_5] : memref<128x128xf32, #tpu.memory_space<vmem>>, vector<128x128xf32>
    %cst = arith.constant dense<0.000000e+00> : vector<128x128xf32>
    %6 = tpu.matmul %4, %5, %cst {dimension_numbers = #tpu.dot_dimension_numbers<[1], [0], [0], [1], [0, 0, 1, 1], [], []>} : vector<128x128xf32>, vector<128x128xf32>, vector<128x128xf32> -> vector<128x128xf32>
    %7 = arith.addf %3, %6 : vector<128x128xf32>
    %c0_6 = arith.constant 0 : index
    %c0_7 = arith.constant 0 : index
    %8 = vector.load %arg6[%c0_6, %c0_7] : memref<128x128xf32, #tpu.memory_space<vmem>>, vector<128x128xf32>
    tpu.vector_store %arg6[%c0_6, %c0_7], %7 {strides = array<i32>} : memref<128x128xf32, #tpu.memory_space<vmem>>, vector<128x128xf32>,
    %c0_i32_8 = arith.constant 0 : i32
    %9 = arith.cmpi eq, %arg2, %c0_i32_8 : i32
    %10 = arith.extui %9 : i1 to i32
    %c0_i32_9 = arith.constant 0 : i32
    %11 = arith.cmpi ne, %10, %c0_i32_9 : i32
    scf.if %11 {
      %c0_10 = arith.constant 0 : index
      %c0_11 = arith.constant 0 : index
      %12 = vector.load %arg6[%c0_10, %c0_11] : memref<128x128xf32, #tpu.memory_space<vmem>>, vector<128x128xf32>
      %c0_12 = arith.constant 0 : index
      %c0_13 = arith.constant 0 : index
      %13 = vector.load %arg5[%c0_12, %c0_13] : memref<128x128xf32, #tpu.memory_space<vmem>>, vector<128x128xf32>
      tpu.vector_store %arg5[%c0_12, %c0_13], %12 {strides = array<i32>} : memref<128x128xf32, #tpu.memory_space<vmem>>, vector<128x128xf32>,
    } else {
    }
    return
  }
  func.func @transform_0(%arg0: i32, %arg1: i32, %arg2: i32) -> (i32, i32) {
    %c0_i32 = arith.constant 0 : i32
    return %arg0, %arg2 : i32, i32
  }
  func.func @transform_1(%arg0: i32, %arg1: i32, %arg2: i32) -> (i32, i32) {
    %c0_i32 = arith.constant 0 : i32
    return %arg2, %arg1 : i32, i32
  }
  func.func @transform_2(%arg0: i32, %arg1: i32, %arg2: i32) -> (i32, i32) {
    %c0_i32 = arith.constant 0 : i32
    return %arg0, %arg1 : i32, i32
  }
}

module attributes {stable_mosaic.version = 11 : i64} {
  func.func @_affine_act_res_kernel(%arg0: i32, %arg1: i32, %arg2: memref<1x4x512xf32, #tpu.memory_space<vmem>>, %arg3: memref<1x4x1xf32, #tpu.memory_space<vmem>>, %arg4: memref<1x4x1xf32, #tpu.memory_space<vmem>>, %arg5: memref<1x4x512xf32, #tpu.memory_space<vmem>>, %arg6: memref<1x4x512xf32, #tpu.memory_space<vmem>>) attributes {dimension_semantics = [#tpu.dimension_semantics<parallel>, #tpu.dimension_semantics<parallel>], iteration_bounds = array<i64: 2, 1>, scalar_prefetch = 0 : i64, scratch_operands = 0 : i64, tpu.core_type = #tpu.core_type<tc>, window_params = [{transform_indices = @transform_0, window_bounds = array<i64: 1, 4, 512>}, {transform_indices = @transform_1, window_bounds = array<i64: 1, 4, 1>}, {transform_indices = @transform_2, window_bounds = array<i64: 1, 4, 1>}, {transform_indices = @transform_3, window_bounds = array<i64: 1, 4, 512>}, {transform_indices = @transform_4, window_bounds = array<i64: 1, 4, 512>}]} {
    %c0 = arith.constant 0 : index
    %c0_0 = arith.constant 0 : index
    %c0_1 = arith.constant 0 : index
    %0 = vector.load %arg2[%c0, %c0_0, %c0_1] : memref<1x4x512xf32, #tpu.memory_space<vmem>>, vector<1x4x512xf32>
    %1 = vector.shape_cast %0 : vector<1x4x512xf32> to vector<4x512xf32>
    %c0_2 = arith.constant 0 : index
    %c0_3 = arith.constant 0 : index
    %c0_4 = arith.constant 0 : index
    %2 = vector.load %arg3[%c0_2, %c0_3, %c0_4] : memref<1x4x1xf32, #tpu.memory_space<vmem>>, vector<1x4x1xf32>
    %3 = vector.shape_cast %2 : vector<1x4x1xf32> to vector<4x1xf32>
    %4 = vector.broadcast %3 : vector<4x1xf32> to vector<4x512xf32>
    %5 = arith.mulf %1, %4 : vector<4x512xf32>
    %c0_5 = arith.constant 0 : index
    %c0_6 = arith.constant 0 : index
    %c0_7 = arith.constant 0 : index
    %6 = vector.load %arg4[%c0_5, %c0_6, %c0_7] : memref<1x4x1xf32, #tpu.memory_space<vmem>>, vector<1x4x1xf32>
    %7 = vector.shape_cast %6 : vector<1x4x1xf32> to vector<4x1xf32>
    %8 = vector.broadcast %7 : vector<4x1xf32> to vector<4x512xf32>
    %9 = arith.addf %5, %8 : vector<4x512xf32>
    %cst = arith.constant 0.000000e+00 : f32
    %10 = vector.broadcast %cst : f32 to vector<4x512xf32>
    %11 = arith.cmpf oge, %9, %10 : vector<4x512xf32>
    %cst_8 = arith.constant 2.500000e-01 : f32
    %12 = vector.broadcast %cst_8 : f32 to vector<4x512xf32>
    %13 = arith.mulf %9, %12 : vector<4x512xf32>
    %14 = arith.select %11, %9, %13 : vector<4x512xi1>, vector<4x512xf32>
    %c0_9 = arith.constant 0 : index
    %c0_10 = arith.constant 0 : index
    %c0_11 = arith.constant 0 : index
    %15 = vector.load %arg5[%c0_9, %c0_10, %c0_11] : memref<1x4x512xf32, #tpu.memory_space<vmem>>, vector<1x4x512xf32>
    %16 = vector.shape_cast %15 : vector<1x4x512xf32> to vector<4x512xf32>
    %17 = arith.addf %14, %16 : vector<4x512xf32>
    %c0_12 = arith.constant 0 : index
    %c0_13 = arith.constant 0 : index
    %c0_14 = arith.constant 0 : index
    %18 = vector.load %arg6[%c0_12, %c0_13, %c0_14] : memref<1x4x512xf32, #tpu.memory_space<vmem>>, vector<1x4x512xf32>
    %19 = vector.shape_cast %18 : vector<1x4x512xf32> to vector<4x512xf32>
    %20 = vector.shape_cast %17 : vector<4x512xf32> to vector<1x4x512xf32>
    tpu.vector_store %arg6[%c0_12, %c0_13, %c0_14], %20 {strides = array<i32>} : memref<1x4x512xf32, #tpu.memory_space<vmem>>, vector<1x4x512xf32>,
    return
  }
  func.func @transform_0(%arg0: i32, %arg1: i32) -> (i32, i32, i32) {
    %c0_i32 = arith.constant 0 : i32
    %c0_i32_0 = arith.constant 0 : i32
    return %arg0, %c0_i32, %arg1 : i32, i32, i32
  }
  func.func @transform_1(%arg0: i32, %arg1: i32) -> (i32, i32, i32) {
    %c0_i32 = arith.constant 0 : i32
    %c0_i32_0 = arith.constant 0 : i32
    %c0_i32_1 = arith.constant 0 : i32
    return %arg0, %c0_i32, %c0_i32_0 : i32, i32, i32
  }
  func.func @transform_2(%arg0: i32, %arg1: i32) -> (i32, i32, i32) {
    %c0_i32 = arith.constant 0 : i32
    %c0_i32_0 = arith.constant 0 : i32
    %c0_i32_1 = arith.constant 0 : i32
    return %arg0, %c0_i32, %c0_i32_0 : i32, i32, i32
  }
  func.func @transform_3(%arg0: i32, %arg1: i32) -> (i32, i32, i32) {
    %c0_i32 = arith.constant 0 : i32
    %c0_i32_0 = arith.constant 0 : i32
    return %arg0, %c0_i32, %arg1 : i32, i32, i32
  }
  func.func @transform_4(%arg0: i32, %arg1: i32) -> (i32, i32, i32) {
    %c0_i32 = arith.constant 0 : i32
    %c0_i32_0 = arith.constant 0 : i32
    return %arg0, %c0_i32, %arg1 : i32, i32, i32
  }
}

module attributes {stable_mosaic.version = 11 : i64} {
  func.func @_matmul_kernel(%arg0: i32, %arg1: i32, %arg2: i32, %arg3: memref<128x128xf32, #tpu.memory_space<vmem>>, %arg4: memref<128x128xf32, #tpu.memory_space<vmem>>, %arg5: memref<128x128xf32, #tpu.memory_space<vmem>>, %arg6: memref<128x128xf32, #tpu.memory_space<vmem>>) attributes {dimension_semantics = [#tpu.dimension_semantics<parallel>, #tpu.dimension_semantics<parallel>, #tpu.dimension_semantics<arbitrary>], iteration_bounds = array<i64: 1, 1, 1>, scalar_prefetch = 0 : i64, scratch_operands = 1 : i64, tpu.core_type = #tpu.core_type<tc>, window_params = [{transform_indices = @transform_0, window_bounds = array<i64: 128, 128>}, {transform_indices = @transform_1, window_bounds = array<i64: 128, 128>}, {transform_indices = @transform_2, window_bounds = array<i64: 128, 128>}]} {
    %c0_i32 = arith.constant 0 : i32
    %0 = arith.cmpi eq, %arg2, %c0_i32 : i32
    %1 = arith.extui %0 : i1 to i32
    %c0_i32_0 = arith.constant 0 : i32
    %2 = arith.cmpi ne, %1, %c0_i32_0 : i32
    scf.if %2 {
      %cst_10 = arith.constant 0.000000e+00 : f32
      %12 = vector.broadcast %cst_10 : f32 to vector<128x128xf32>
      %c0_11 = arith.constant 0 : index
      %c0_12 = arith.constant 0 : index
      %13 = vector.load %arg6[%c0_11, %c0_12] : memref<128x128xf32, #tpu.memory_space<vmem>>, vector<128x128xf32>
      tpu.vector_store %arg6[%c0_11, %c0_12], %12 {strides = array<i32>} : memref<128x128xf32, #tpu.memory_space<vmem>>, vector<128x128xf32>,
    } else {
    }
    %c0 = arith.constant 0 : index
    %c0_1 = arith.constant 0 : index
    %3 = vector.load %arg6[%c0, %c0_1] : memref<128x128xf32, #tpu.memory_space<vmem>>, vector<128x128xf32>
    %c0_2 = arith.constant 0 : index
    %c0_3 = arith.constant 0 : index
    %4 = vector.load %arg3[%c0_2, %c0_3] : memref<128x128xf32, #tpu.memory_space<vmem>>, vector<128x128xf32>
    %c0_4 = arith.constant 0 : index
    %c0_5 = arith.constant 0 : index
    %5 = vector.load %arg4[%c0_4, %c0_5] : memref<128x128xf32, #tpu.memory_space<vmem>>, vector<128x128xf32>
    %cst = arith.constant dense<0.000000e+00> : vector<128x128xf32>
    %6 = tpu.matmul %4, %5, %cst {dimension_numbers = #tpu.dot_dimension_numbers<[1], [0], [0], [1], [0, 0, 1, 1], [], []>} : vector<128x128xf32>, vector<128x128xf32>, vector<128x128xf32> -> vector<128x128xf32>
    %7 = arith.addf %3, %6 : vector<128x128xf32>
    %c0_6 = arith.constant 0 : index
    %c0_7 = arith.constant 0 : index
    %8 = vector.load %arg6[%c0_6, %c0_7] : memref<128x128xf32, #tpu.memory_space<vmem>>, vector<128x128xf32>
    tpu.vector_store %arg6[%c0_6, %c0_7], %7 {strides = array<i32>} : memref<128x128xf32, #tpu.memory_space<vmem>>, vector<128x128xf32>,
    %c0_i32_8 = arith.constant 0 : i32
    %9 = arith.cmpi eq, %arg2, %c0_i32_8 : i32
    %10 = arith.extui %9 : i1 to i32
    %c0_i32_9 = arith.constant 0 : i32
    %11 = arith.cmpi ne, %10, %c0_i32_9 : i32
    scf.if %11 {
      %c0_10 = arith.constant 0 : index
      %c0_11 = arith.constant 0 : index
      %12 = vector.load %arg6[%c0_10, %c0_11] : memref<128x128xf32, #tpu.memory_space<vmem>>, vector<128x128xf32>
      %c0_12 = arith.constant 0 : index
      %c0_13 = arith.constant 0 : index
      %13 = vector.load %arg5[%c0_12, %c0_13] : memref<128x128xf32, #tpu.memory_space<vmem>>, vector<128x128xf32>
      tpu.vector_store %arg5[%c0_12, %c0_13], %12 {strides = array<i32>} : memref<128x128xf32, #tpu.memory_space<vmem>>, vector<128x128xf32>,
    } else {
    }
    return
  }
  func.func @transform_0(%arg0: i32, %arg1: i32, %arg2: i32) -> (i32, i32) {
    %c0_i32 = arith.constant 0 : i32
    return %arg0, %arg2 : i32, i32
  }
  func.func @transform_1(%arg0: i32, %arg1: i32, %arg2: i32) -> (i32, i32) {
    %c0_i32 = arith.constant 0 : i32
    return %arg2, %arg1 : i32, i32
  }
  func.func @transform_2(%arg0: i32, %arg1: i32, %arg2: i32) -> (i32, i32) {
    %c0_i32 = arith.constant 0 : i32
    return %arg0, %arg1 : i32, i32
  }
}

module attributes {stable_mosaic.version = 11 : i64} {
  func.func @_affine_act_kernel(%arg0: i32, %arg1: i32, %arg2: memref<1x4x64xf32, #tpu.memory_space<vmem>>, %arg3: memref<1x4x1xf32, #tpu.memory_space<vmem>>, %arg4: memref<1x4x1xf32, #tpu.memory_space<vmem>>, %arg5: memref<1x4x64xf32, #tpu.memory_space<vmem>>) attributes {dimension_semantics = [#tpu.dimension_semantics<parallel>, #tpu.dimension_semantics<parallel>], iteration_bounds = array<i64: 2, 1>, scalar_prefetch = 0 : i64, scratch_operands = 0 : i64, tpu.core_type = #tpu.core_type<tc>, window_params = [{transform_indices = @transform_0, window_bounds = array<i64: 1, 4, 64>}, {transform_indices = @transform_1, window_bounds = array<i64: 1, 4, 1>}, {transform_indices = @transform_2, window_bounds = array<i64: 1, 4, 1>}, {transform_indices = @transform_3, window_bounds = array<i64: 1, 4, 64>}]} {
    %c0 = arith.constant 0 : index
    %c0_0 = arith.constant 0 : index
    %c0_1 = arith.constant 0 : index
    %0 = vector.load %arg2[%c0, %c0_0, %c0_1] : memref<1x4x64xf32, #tpu.memory_space<vmem>>, vector<1x4x64xf32>
    %1 = vector.shape_cast %0 : vector<1x4x64xf32> to vector<4x64xf32>
    %c0_2 = arith.constant 0 : index
    %c0_3 = arith.constant 0 : index
    %c0_4 = arith.constant 0 : index
    %2 = vector.load %arg3[%c0_2, %c0_3, %c0_4] : memref<1x4x1xf32, #tpu.memory_space<vmem>>, vector<1x4x1xf32>
    %3 = vector.shape_cast %2 : vector<1x4x1xf32> to vector<4x1xf32>
    %4 = vector.broadcast %3 : vector<4x1xf32> to vector<4x64xf32>
    %5 = arith.mulf %1, %4 : vector<4x64xf32>
    %c0_5 = arith.constant 0 : index
    %c0_6 = arith.constant 0 : index
    %c0_7 = arith.constant 0 : index
    %6 = vector.load %arg4[%c0_5, %c0_6, %c0_7] : memref<1x4x1xf32, #tpu.memory_space<vmem>>, vector<1x4x1xf32>
    %7 = vector.shape_cast %6 : vector<1x4x1xf32> to vector<4x1xf32>
    %8 = vector.broadcast %7 : vector<4x1xf32> to vector<4x64xf32>
    %9 = arith.addf %5, %8 : vector<4x64xf32>
    %cst = arith.constant 0.000000e+00 : f32
    %10 = vector.broadcast %cst : f32 to vector<4x64xf32>
    %11 = arith.cmpf oge, %9, %10 : vector<4x64xf32>
    %cst_8 = arith.constant 2.500000e-01 : f32
    %12 = vector.broadcast %cst_8 : f32 to vector<4x64xf32>
    %13 = arith.mulf %9, %12 : vector<4x64xf32>
    %14 = arith.select %11, %9, %13 : vector<4x64xi1>, vector<4x64xf32>
    %c0_9 = arith.constant 0 : index
    %c0_10 = arith.constant 0 : index
    %c0_11 = arith.constant 0 : index
    %15 = vector.load %arg5[%c0_9, %c0_10, %c0_11] : memref<1x4x64xf32, #tpu.memory_space<vmem>>, vector<1x4x64xf32>
    %16 = vector.shape_cast %15 : vector<1x4x64xf32> to vector<4x64xf32>
    %17 = vector.shape_cast %14 : vector<4x64xf32> to vector<1x4x64xf32>
    tpu.vector_store %arg5[%c0_9, %c0_10, %c0_11], %17 {strides = array<i32>} : memref<1x4x64xf32, #tpu.memory_space<vmem>>, vector<1x4x64xf32>,
    return
  }
  func.func @transform_0(%arg0: i32, %arg1: i32) -> (i32, i32, i32) {
    %c0_i32 = arith.constant 0 : i32
    %c0_i32_0 = arith.constant 0 : i32
    return %arg0, %c0_i32, %arg1 : i32, i32, i32
  }
  func.func @transform_1(%arg0: i32, %arg1: i32) -> (i32, i32, i32) {
    %c0_i32 = arith.constant 0 : i32
    %c0_i32_0 = arith.constant 0 : i32
    %c0_i32_1 = arith.constant 0 : i32
    return %arg0, %c0_i32, %c0_i32_0 : i32, i32, i32
  }
  func.func @transform_2(%arg0: i32, %arg1: i32) -> (i32, i32, i32) {
    %c0_i32 = arith.constant 0 : i32
    %c0_i32_0 = arith.constant 0 : i32
    %c0_i32_1 = arith.constant 0 : i32
    return %arg0, %c0_i32, %c0_i32_0 : i32, i32, i32
  }
  func.func @transform_3(%arg0: i32, %arg1: i32) -> (i32, i32, i32) {
    %c0_i32 = arith.constant 0 : i32
    %c0_i32_0 = arith.constant 0 : i32
    return %arg0, %c0_i32, %arg1 : i32, i32, i32
  }
}

module attributes {stable_mosaic.version = 11 : i64} {
  func.func @_affine_act_kernel(%arg0: i32, %arg1: i32, %arg2: memref<1x4x64xf32, #tpu.memory_space<vmem>>, %arg3: memref<1x4x1xf32, #tpu.memory_space<vmem>>, %arg4: memref<1x4x1xf32, #tpu.memory_space<vmem>>, %arg5: memref<1x4x64xf32, #tpu.memory_space<vmem>>) attributes {dimension_semantics = [#tpu.dimension_semantics<parallel>, #tpu.dimension_semantics<parallel>], iteration_bounds = array<i64: 2, 1>, scalar_prefetch = 0 : i64, scratch_operands = 0 : i64, tpu.core_type = #tpu.core_type<tc>, window_params = [{transform_indices = @transform_0, window_bounds = array<i64: 1, 4, 64>}, {transform_indices = @transform_1, window_bounds = array<i64: 1, 4, 1>}, {transform_indices = @transform_2, window_bounds = array<i64: 1, 4, 1>}, {transform_indices = @transform_3, window_bounds = array<i64: 1, 4, 64>}]} {
    %c0 = arith.constant 0 : index
    %c0_0 = arith.constant 0 : index
    %c0_1 = arith.constant 0 : index
    %0 = vector.load %arg2[%c0, %c0_0, %c0_1] : memref<1x4x64xf32, #tpu.memory_space<vmem>>, vector<1x4x64xf32>
    %1 = vector.shape_cast %0 : vector<1x4x64xf32> to vector<4x64xf32>
    %c0_2 = arith.constant 0 : index
    %c0_3 = arith.constant 0 : index
    %c0_4 = arith.constant 0 : index
    %2 = vector.load %arg3[%c0_2, %c0_3, %c0_4] : memref<1x4x1xf32, #tpu.memory_space<vmem>>, vector<1x4x1xf32>
    %3 = vector.shape_cast %2 : vector<1x4x1xf32> to vector<4x1xf32>
    %4 = vector.broadcast %3 : vector<4x1xf32> to vector<4x64xf32>
    %5 = arith.mulf %1, %4 : vector<4x64xf32>
    %c0_5 = arith.constant 0 : index
    %c0_6 = arith.constant 0 : index
    %c0_7 = arith.constant 0 : index
    %6 = vector.load %arg4[%c0_5, %c0_6, %c0_7] : memref<1x4x1xf32, #tpu.memory_space<vmem>>, vector<1x4x1xf32>
    %7 = vector.shape_cast %6 : vector<1x4x1xf32> to vector<4x1xf32>
    %8 = vector.broadcast %7 : vector<4x1xf32> to vector<4x64xf32>
    %9 = arith.addf %5, %8 : vector<4x64xf32>
    %c0_8 = arith.constant 0 : index
    %c0_9 = arith.constant 0 : index
    %c0_10 = arith.constant 0 : index
    %10 = vector.load %arg5[%c0_8, %c0_9, %c0_10] : memref<1x4x64xf32, #tpu.memory_space<vmem>>, vector<1x4x64xf32>
    %11 = vector.shape_cast %10 : vector<1x4x64xf32> to vector<4x64xf32>
    %12 = vector.shape_cast %9 : vector<4x64xf32> to vector<1x4x64xf32>
    tpu.vector_store %arg5[%c0_8, %c0_9, %c0_10], %12 {strides = array<i32>} : memref<1x4x64xf32, #tpu.memory_space<vmem>>, vector<1x4x64xf32>,
    return
  }
  func.func @transform_0(%arg0: i32, %arg1: i32) -> (i32, i32, i32) {
    %c0_i32 = arith.constant 0 : i32
    %c0_i32_0 = arith.constant 0 : i32
    return %arg0, %c0_i32, %arg1 : i32, i32, i32
  }
  func.func @transform_1(%arg0: i32, %arg1: i32) -> (i32, i32, i32) {
    %c0_i32 = arith.constant 0 : i32
    %c0_i32_0 = arith.constant 0 : i32
    %c0_i32_1 = arith.constant 0 : i32
    return %arg0, %c0_i32, %c0_i32_0 : i32, i32, i32
  }
  func.func @transform_2(%arg0: i32, %arg1: i32) -> (i32, i32, i32) {
    %c0_i32 = arith.constant 0 : i32
    %c0_i32_0 = arith.constant 0 : i32
    %c0_i32_1 = arith.constant 0 : i32
    return %arg0, %c0_i32, %c0_i32_0 : i32, i32, i32
  }
  func.func @transform_3(%arg0: i32, %arg1: i32) -> (i32, i32, i32) {
    %c0_i32 = arith.constant 0 : i32
    %c0_i32_0 = arith.constant 0 : i32
    return %arg0, %c0_i32, %arg1 : i32, i32, i32
  }
}

</mosaic_0001>

<bundles_post_ra>
// kernel: _lambda_.11
= control target key start
LH: loop header
LB: loop body
LE: loop exit
PB: predicated region body
PF: predicated region fallthrough
CT: control target
= control target key end

     0   :  { %s974_s9 = smov 0   ;;  %s976_s10 = smov 0   ;;  %s1140_s0 = inlined_call_operand.vmem [shape: f32[1024,256], index: 0, kind: input, shape index: {}]   ;;  %s1141_s1 = inlined_call_operand.vmem [shape: f32[256,128], index: 1, kind: input, shape index: {}]   ;;  %s1142_s2 = inlined_call_operand.vmem [shape: f32[1024,128], index: 2, kind: output, shape index: {}]  }
   0x1   :  { %s978_s11 = smov 0   ;;  %s980_s12 = smov 0  }
   0x2   :  { %s982_s13 = smov 0   ;;  %s984_s14 = smov 0  }
   0x3   :  { %s986_s15 = smov 0  }
   0x4 LB: > { %s24_s16 = sadd.s32 1, %s948_s13  ;;  %s31_s17 = sadd.s32 1, %s952_s14  ;;  %s956_s15 = sphi %s986_s15, %s12_s15   ;;  %s952_s14 = sphi %s984_s14, %s1148_s14   ;;  %s948_s13 = sphi %s982_s13, %s1147_s13   ;;  %s944_s12 = sphi %s980_s12, %s1146_s12   ;;  %s940_s11 = sphi %s978_s11, %s1145_s11   ;;  %s936_s10 = sphi %s976_s10, %s1144_s10   ;;  %s932_s9 = sphi %s974_s9, %s1143_s9  }
   0x5   : > { %p25_p0 = scmp.ge.s32.totalorder %s24_s16, 2  ;;  %p47_p1 = scmp.ne.s32.totalorder %s936_s10, %s932_s9 }
   0x6   : > { %p48_p2 = scmp.eq.s32.totalorder %s956_s15, 0  ;;  %s40_s21 = sadd.s32 1, %s936_s10 }
   0x7   : > { %s1150_s16 = smov (%p25_p0, %s24_s16), 0  ;;  %s1152_s17 = smov (!%p25_p0, %s31_s17), %s952_s14 }
   0x8   : > { %p49_p3 = por %p48_p2, %p47_p1  ;;  %p33_p4 = scmp.ge.s32.totalorder %s1152_s17, 8 }
   0x9   : > { %s36_s18 = ssub.s32 %s948_s13, %s1150_s16  ;;  %p693_p6 = scmp.ge.s32.totalorder %s956_s15, 16 }
   0xa   : > { %s1154_s17 = smov (%p33_p4, %s1152_s17), 0 }
   0xb   : > { %s35_s19 = ssub.s32 %s952_s14, %s1154_s17  ;;  %129 = sbr.rel (%p693_p6) target bundleno = 32 (0x20), region = 16 }
   0xc   : > { %s37_s20 = sor.u32 %s36_s18, %s35_s19 }
   0xd   : > { %p38_p5 = scmp.eq.s32.totalorder %s37_s20, 0 }
   0xf   : > { %s1025_s22 = scalar_select %p38_p5, %s936_s10, %s40_s21  }
  0x12   : > { %132 = sbr.rel (!%p49_p3) target bundleno = 32 (0x20), region = 20  ;;  %s134_s23 = sand.u32 (%p49_p3), 1, %s936_s10  }
  0x13   : > { %s708_s24 = sshll.u32 (%p49_p3), %s952_s14, 5  ;;  %s694_s25 = sshll.u32 (%p49_p3), %s134_s23, 7 }
  0x14   : > { %s139_s26 = sadd.s32 (%p49_p3), %s948_s13, %s708_s24  ;;  %s136_s3 = scalar_lea.vmem (%p49_p3), [#allocation3], %s694_s25 }
  0x15   : > { %s697_s27 = sshll.u32 (%p49_p3), %s139_s26, 3 }
  0x16   : > { %s1034_s30 = scalar_lea.vmem (%p49_p3), %s1140_s0, %s697_s27 }
  0x17   : > { %v199_v0 = vld [vmem:[%s1034_s30] sm:$0xff] (%p49_p3)  ;;  %v201_v1 = vld [vmem:[%s1034_s30 + $0x10] sm:$0xff] (%p49_p3) }
  0x18   : > { %v203_v2 = vld [vmem:[%s1034_s30 + $0x20] sm:$0xff] (%p49_p3)  ;;  %200 = vst [vmem:[%s136_s3] sm:$0xff] (%p49_p3), %v199_v0  ;;  %202 = vst [vmem:[%s136_s3 + $0x8] sm:$0xff] (%p49_p3), %v201_v1  ;;  %v205_v3 = vld [vmem:[%s1034_s30 + $0x30] sm:$0xff] (%p49_p3) }
  0x19   : > { %204 = vst [vmem:[%s136_s3 + $0x10] sm:$0xff] %v203_v2  ;;  %v207_v4 = vld [vmem:[%s1034_s30 + $0x40] sm:$0xff]  ;;  %v209_v5 = vld [vmem:[%s1034_s30 + $0x50] sm:$0xff]  ;;  %206 = vst [vmem:[%s136_s3 + $0x18] sm:$0xff] %v205_v3 }
  0x1a   : > { %208 = vst [vmem:[%s136_s3 + $0x20] sm:$0xff] %v207_v4  ;;  %210 = vst [vmem:[%s136_s3 + $0x28] sm:$0xff] %v209_v5  ;;  %v211_v6 = vld [vmem:[%s1034_s30 + $0x60] sm:$0xff]  ;;  %v213_v7 = vld [vmem:[%s1034_s30 + $0x70] sm:$0xff] }
  0x1b   : > { %v215_v8 = vld [vmem:[%s1034_s30 + $0x80] sm:$0xff]  ;;  %212 = vst [vmem:[%s136_s3 + $0x30] sm:$0xff] %v211_v6  ;;  %214 = vst [vmem:[%s136_s3 + $0x38] sm:$0xff] %v213_v7  ;;  %v217_v9 = vld [vmem:[%s1034_s30 + $0x90] sm:$0xff] }
  0x1c   : > { %216 = vst [vmem:[%s136_s3 + $0x40] sm:$0xff] %v215_v8  ;;  %v219_v10 = vld [vmem:[%s1034_s30 + $0xa0] sm:$0xff]  ;;  %v221_v11 = vld [vmem:[%s1034_s30 + $0xb0] sm:$0xff]  ;;  %218 = vst [vmem:[%s136_s3 + $0x48] sm:$0xff] %v217_v9 }
  0x1d   : > { %220 = vst [vmem:[%s136_s3 + $0x50] sm:$0xff] %v219_v10  ;;  %222 = vst [vmem:[%s136_s3 + $0x58] sm:$0xff] %v221_v11  ;;  %v223_v12 = vld [vmem:[%s1034_s30 + $0xc0] sm:$0xff]  ;;  %v225_v13 = vld [vmem:[%s1034_s30 + $0xd0] sm:$0xff] }
  0x1e   : > { %v227_v14 = vld [vmem:[%s1034_s30 + $0xe0] sm:$0xff]  ;;  %224 = vst [vmem:[%s136_s3 + $0x60] sm:$0xff] %v223_v12  ;;  %226 = vst [vmem:[%s136_s3 + $0x68] sm:$0xff] %v225_v13  ;;  %v229_v15 = vld [vmem:[%s1034_s30 + $0xf0] sm:$0xff] }
  0x1f   : > { %228 = vst [vmem:[%s136_s3 + $0x70] sm:$0xff] %v227_v14  ;;  %230 = vst [vmem:[%s136_s3 + $0x78] sm:$0xff] %v229_v15 }
  0x20 PF: > { %p698_p7 = scmp.ge.s32.totalorder %s956_s15, 1  ;;  %p247_p8 = scmp.lt.s32.totalorder %s956_s15, 17 }
  0x22   : > { %p248_p9 = pnand %p698_p7, %p247_p8 }
  0x23   : > { %s254_s4 = sand.u32 (!%p248_p9), 1, %s932_s9   ;;  %s700_s5 = sshll.u32 (!%p248_p9), %s940_s11, 4 }
  0x24   : > { %251 = sbr.rel (%p248_p9) target bundleno = 325 (0x145), region = 62  ;;  %s699_s6 = sshll.u32 (!%p248_p9), %s254_s4, 7 }
  0x25   : > { %p288_p10 = scmp.lt.s32.totalorder (!%p248_p9), %s700_s5, 31  ;;  %s702_s7 = sshll.u32 (!%p248_p9), %s944_s12, 4 }
  0x26   : > { %p297_p11 = scmp.lt.s32.totalorder (!%p248_p9), %s702_s7, 127  ;;  %s1067_s9 = scalar_lea.vmem (!%p248_p9), [#allocation3], %s699_s6 }
  0x27   : > { %p704_p12 = scmp.ne.s32.totalorder (!%p248_p9), %s940_s11, 0 }
  0x2b   : > { %s1156_s5 = smov (!%p288_p10, %s700_s5), 31  ;;  %s1158_s7 = smov (!%p297_p11, %s702_s7), 127 }
  0x2c   : > { %s701_s8 = sshll.u32 %s1156_s5, 3  ;;  %s703_s21 = sshll.u32 %s1158_s7, 3  ;;  %v958_v16 = vmov (!%p704_p12), 0.0  }
  0x2d   : > { %s1060_s20 = scalar_lea.vmem %s1141_s1, %s701_s8  ;;  %s1065_s25 = scalar_lea.vmem %s1142_s2, %s703_s21  ;;  %309 = vst [vmem:[#allocation2] sm:$0xff] (!%p704_p12), %v958_v16  ;;  %310 = vst [vmem:[#allocation2 + $0x8] sm:$0xff] (!%p704_p12), %v958_v16 }
  0x2e   : > { %308 = sbr.rel (%p704_p12) target bundleno = 53 (0x35), region = 70  ;;  %311 = vst [vmem:[#allocation2 + $0x10] sm:$0xff] (!%p704_p12), %v958_v16  ;;  %312 = vst [vmem:[#allocation2 + $0x18] sm:$0xff] (!%p704_p12), %v958_v16 }
  0x2f   : > { %313 = vst [vmem:[#allocation2 + $0x20] sm:$0xff] (!%p704_p12), %v958_v16  ;;  %314 = vst [vmem:[#allocation2 + $0x28] sm:$0xff] (!%p704_p12), %v958_v16 }
  0x30   : > { %315 = vst [vmem:[#allocation2 + $0x30] sm:$0xff] (!%p704_p12), %v958_v16  ;;  %316 = vst [vmem:[#allocation2 + $0x38] sm:$0xff] (!%p704_p12), %v958_v16 }
  0x31   : > { %317 = vst [vmem:[#allocation2 + $0x40] sm:$0xff] (!%p704_p12), %v958_v16  ;;  %318 = vst [vmem:[#allocation2 + $0x48] sm:$0xff] (!%p704_p12), %v958_v16 }
  0x32   : > { %319 = vst [vmem:[#allocation2 + $0x50] sm:$0xff] (!%p704_p12), %v958_v16  ;;  %320 = vst [vmem:[#allocation2 + $0x58] sm:$0xff] (!%p704_p12), %v958_v16 }
  0x33   : > { %321 = vst [vmem:[#allocation2 + $0x60] sm:$0xff] (!%p704_p12), %v958_v16  ;;  %322 = vst [vmem:[#allocation2 + $0x68] sm:$0xff] (!%p704_p12), %v958_v16 }
  0x34   : > { %323 = vst [vmem:[#allocation2 + $0x70] sm:$0xff] (!%p704_p12), %v958_v16  ;;  %324 = vst [vmem:[#allocation2 + $0x78] sm:$0xff] (!%p704_p12), %v958_v16 }
  0x35 PF: > { %v357_v17 = vld [vmem:[%s1060_s20] sm:$0xff]  ;;  %v358_v18 = vld [vmem:[%s1060_s20 + $0x8] sm:$0xff]  ;;  %v359_v19 = vld [vmem:[%s1060_s20 + $0x10] sm:$0xff]  ;;  %p705_p13 = scmp.ne.s32.totalorder %s940_s11, 1 }
  0x36   : > { %v797_v20 = vpack.c.bf16 %v358_v18, %v357_v17  ;;  %v360_v21 = vld [vmem:[%s1060_s20 + $0x18] sm:$0xff]  ;;  %v361_v23 = vld [vmem:[%s1060_s20 + $0x20] sm:$0xff]  ;;  %v362_v24 = vld [vmem:[%s1060_s20 + $0x28] sm:$0xff] }
  0x37   : > { %v801_v22 = vpack.c.bf16 %v360_v21, %v359_v19  ;;  %v805_v25 = vpack.c.bf16 %v362_v24, %v361_v23  ;;  %v341_v26 = vld [vmem:[%s1067_s9] sm:$0xff]  ;;  %v363_v28 = vld [vmem:[%s1060_s20 + $0x30] sm:$0xff]  ;;  %v364_v29 = vld [vmem:[%s1060_s20 + $0x38] sm:$0xff] }
  0x38   : > { %798 = vmatprep.subr.bf16.mxu0 %v797_v20  ;;  %829 = vmatprep.subr.bf16.mxu1 %v797_v20  ;;  %v349_v27 = vld [vmem:[%s1067_s9 + $0x40] sm:$0xff]  ;;  %v809_v30 = vpack.c.bf16 %v364_v29, %v363_v28  ;;  %v366_v32 = vld [vmem:[%s1060_s20 + $0x48] sm:$0xff]  ;;  %v367_v34 = vld [vmem:[%s1060_s20 + $0x50] sm:$0xff] }
  0x39   : > { %800 = vmatpush3.bf16.msra.mxu0 %v797_v20  ;;  %837 = vmatpush3.bf16.msra.mxu1 %v797_v20  ;;  %v365_v31 = vld [vmem:[%s1060_s20 + $0x40] sm:$0xff]  ;;  %v368_v35 = vld [vmem:[%s1060_s20 + $0x58] sm:$0xff]  ;;  %v370_v38 = vld [vmem:[%s1060_s20 + $0x68] sm:$0xff] }
  0x3a   : > { %802 = vmatprep.subr.bf16.mxu0 %v801_v22  ;;  %830 = vmatprep.subr.bf16.mxu1 %v801_v22  ;;  %v813_v33 = vpack.c.bf16 %v366_v32, %v365_v31  ;;  %v817_v36 = vpack.c.bf16 %v368_v35, %v367_v34  ;;  %v369_v37 = vld [vmem:[%s1060_s20 + $0x60] sm:$0xff]  ;;  %v371_v40 = vld [vmem:[%s1060_s20 + $0x70] sm:$0xff]  ;;  %v372_v41 = vld [vmem:[%s1060_s20 + $0x78] sm:$0xff] }
  0x3b   : > { %773 = vmatprep.mubr.f32.mxu0 %v341_v26  ;;  %785 = vmatprep.mubr.f32.mxu1 %v349_v27  ;;  %v821_v39 = vpack.c.bf16 %v370_v38, %v369_v37  ;;  %v825_v42 = vpack.c.bf16 %v372_v41, %v371_v40  ;;  %v342_v43 = vld [vmem:[%s1067_s9 + $0x8] sm:$0xff]  ;;  %v343_v45 = vld [vmem:[%s1067_s9 + $0x10] sm:$0xff]  ;;  %v344_v47 = vld [vmem:[%s1067_s9 + $0x18] sm:$0xff] }
  0x3c   : > { %v350_v44 = vld [vmem:[%s1067_s9 + $0x48] sm:$0xff]  ;;  %v351_v46 = vld [vmem:[%s1067_s9 + $0x50] sm:$0xff]  ;;  %v352_v48 = vld [vmem:[%s1067_s9 + $0x58] sm:$0xff] }
  0x3d   : > { %804 = vmatpush3.bf16.msra.mxu0 %v801_v22  ;;  %838 = vmatpush3.bf16.msra.mxu1 %v801_v22  ;;  %v345_v49 = vld [vmem:[%s1067_s9 + $0x20] sm:$0xff]  ;;  %v346_v51 = vld [vmem:[%s1067_s9 + $0x28] sm:$0xff]  ;;  %v347_v53 = vld [vmem:[%s1067_s9 + $0x30] sm:$0xff] }
  0x3e   : > { %806 = vmatprep.subr.bf16.mxu0 %v805_v25  ;;  %831 = vmatprep.subr.bf16.mxu1 %v805_v25  ;;  %v353_v50 = vld [vmem:[%s1067_s9 + $0x60] sm:$0xff]  ;;  %v354_v52 = vld [vmem:[%s1067_s9 + $0x68] sm:$0xff]  ;;  %v355_v54 = vld [vmem:[%s1067_s9 + $0x70] sm:$0xff] }
  0x3f   : > { %v348_v55 = vld [vmem:[%s1067_s9 + $0x38] sm:$0xff]  ;;  %v326_v57 = vld [vmem:[#allocation2 + $0x8] sm:$0xff]  ;;  %v325_v59 = vld [vmem:[#allocation2] sm:$0xff] }
  0x40   : > { %v356_v56 = vld [vmem:[%s1067_s9 + $0x78] sm:$0xff]  ;;  %v334_v58 = vld [vmem:[#allocation2 + $0x48] sm:$0xff]  ;;  %v333_v60 = vld [vmem:[#allocation2 + $0x40] sm:$0xff] }
  0x41   : > { %808 = vmatpush3.bf16.msra.mxu0 %v805_v25  ;;  %839 = vmatpush3.bf16.msra.mxu1 %v805_v25  ;;  %v328_v5 = vld [vmem:[#allocation2 + $0x18] sm:$0xff]  ;;  %v327_v7 = vld [vmem:[#allocation2 + $0x10] sm:$0xff]  ;;  %v330_v17 = vld [vmem:[#allocation2 + $0x28] sm:$0xff] }
  0x42   : > { %810 = vmatprep.subr.bf16.mxu0 %v809_v30  ;;  %832 = vmatprep.subr.bf16.mxu1 %v809_v30  ;;  %v336_v6 = vld [vmem:[#allocation2 + $0x58] sm:$0xff]  ;;  %v335_v8 = vld [vmem:[#allocation2 + $0x50] sm:$0xff]  ;;  %v338_v18 = vld [vmem:[#allocation2 + $0x68] sm:$0xff] }
  0x43   : > { %v329_v19 = vld [vmem:[#allocation2 + $0x20] sm:$0xff]  ;;  %v332_v29 = vld [vmem:[#allocation2 + $0x38] sm:$0xff]  ;;  %v331_v31 = vld [vmem:[#allocation2 + $0x30] sm:$0xff] }
  0x44   : > { %v337_v20 = vld [vmem:[#allocation2 + $0x60] sm:$0xff]  ;;  %v339_v32 = vld [vmem:[#allocation2 + $0x70] sm:$0xff] }
  0x45   : > { %812 = vmatpush3.bf16.msra.mxu0 %v809_v30  ;;  %840 = vmatpush3.bf16.msra.mxu1 %v809_v30  ;;  %v340_v30 = vld [vmem:[#allocation2 + $0x78] sm:$0xff] }
  0x46   : > { %814 = vmatprep.subr.bf16.mxu0 %v813_v33  ;;  %833 = vmatprep.subr.bf16.mxu1 %v813_v33 }
  0x49   : > { %816 = vmatpush3.bf16.msra.mxu0 %v813_v33  ;;  %841 = vmatpush3.bf16.msra.mxu1 %v813_v33 }
  0x4a   : > { %818 = vmatprep.subr.bf16.mxu0 %v817_v36  ;;  %834 = vmatprep.subr.bf16.mxu1 %v817_v36 }
  0x4d   : > { %820 = vmatpush3.bf16.msra.mxu0 %v817_v36  ;;  %842 = vmatpush3.bf16.msra.mxu1 %v817_v36 }
  0x4e   : > { %822 = vmatprep.subr.bf16.mxu0 %v821_v39  ;;  %835 = vmatprep.subr.bf16.mxu1 %v821_v39 }
  0x51   : > { %824 = vmatpush3.bf16.msra.mxu0 %v821_v39  ;;  %843 = vmatpush3.bf16.msra.mxu1 %v821_v39 }
  0x52   : > { %826 = vmatprep.subr.bf16.mxu0 %v825_v42  ;;  %836 = vmatprep.subr.bf16.mxu1 %v825_v42 }
  0x55   : > { %828 = vmatpush3.bf16.msra.mxu0 %v825_v42  ;;  %844 = vmatpush3.bf16.msra.mxu1 %v825_v42 }
  0x58   : > { %774 = vmatmul.mubr.f32.vlgmr.msra.gmra.mrb[0].mxu0 %v342_v43  ;;  %786 = vmatmul.mubr.f32.vlgmr.msra.gmra.mrb[0].mxu1 %v350_v44 }
  0x59   : > { %776 = vmatprep.mubr.f32.mxu0 %v343_v45  ;;  %788 = vmatprep.mubr.f32.mxu1 %v351_v46 }
  0x5c   : > { %777 = vmatmul.mubr.f32.gmra.mrb[2].mxu0 %v344_v47  ;;  %789 = vmatmul.mubr.f32.gmra.mrb[2].mxu1 %v352_v48 }
  0x5d   : > { %779 = vmatprep.mubr.f32.mxu0 %v345_v49  ;;  %791 = vmatprep.mubr.f32.mxu1 %v353_v50 }
  0x60   : > { %780 = vmatmul.mubr.f32.gmra.mrb[4].mxu0 %v346_v51  ;;  %792 = vmatmul.mubr.f32.gmra.mrb[4].mxu1 %v354_v52 }
  0x61   : > { %782 = vmatprep.mubr.f32.mxu0 %v347_v53  ;;  %794 = vmatprep.mubr.f32.mxu1 %v355_v54 }
  0x64   : > { %783 = vmatmul.mubr.f32.gmra.mrb[6].mxu0 %v348_v55  ;;  %795 = vmatmul.mubr.f32.gmra.mrb[6].mxu1 %v356_v56 }
 0x12b   : > { %v775_v61 = vpop.f32.mrb[0].mxu0  ;;  %v787_v62 = vpop.f32.mrb[0].mxu1 }
 0x12c   : > { %v519_v63 = vadd.f32 %v775_v61, %v326_v57  ;;  %v527_v0 = vadd.f32 %v787_v62, %v334_v58  ;;  %v439_v1 = vpop.f32.mrb[1].mxu0  ;;  %v479_v2 = vpop.f32.mrb[1].mxu1 }
 0x12d   : > { %v518_v3 = vadd.f32 %v439_v1, %v325_v59  ;;  %v526_v4 = vadd.f32 %v479_v2, %v333_v60 }
 0x12e   : > { %535 = vst [vmem:[#allocation2 + $0x8] sm:$0xff] %v519_v63  ;;  %543 = vst [vmem:[#allocation2 + $0x48] sm:$0xff] %v527_v0 }
 0x12f   : > { %534 = vst [vmem:[#allocation2] sm:$0xff] %v518_v3  ;;  %542 = vst [vmem:[#allocation2 + $0x40] sm:$0xff] %v526_v4  ;;  %v778_v9 = vpop.f32.mrb[2].mxu0  ;;  %v790_v10 = vpop.f32.mrb[2].mxu1 }
 0x130   : > { %v521_v11 = vadd.f32 %v778_v9, %v328_v5  ;;  %v529_v12 = vadd.f32 %v790_v10, %v336_v6  ;;  %v449_v13 = vpop.f32.mrb[3].mxu0  ;;  %v489_v14 = vpop.f32.mrb[3].mxu1 }
 0x131   : > { %v520_v15 = vadd.f32 %v449_v13, %v327_v7  ;;  %v528_v16 = vadd.f32 %v489_v14, %v335_v8 }
 0x132   : > { %537 = vst [vmem:[#allocation2 + $0x18] sm:$0xff] %v521_v11  ;;  %545 = vst [vmem:[#allocation2 + $0x58] sm:$0xff] %v529_v12 }
 0x133   : > { %536 = vst [vmem:[#allocation2 + $0x10] sm:$0xff] %v520_v15  ;;  %544 = vst [vmem:[#allocation2 + $0x50] sm:$0xff] %v528_v16  ;;  %v781_v21 = vpop.f32.mrb[4].mxu0  ;;  %v793_v22 = vpop.f32.mrb[4].mxu1 }
 0x134   : > { %v523_v23 = vadd.f32 %v781_v21, %v330_v17  ;;  %v531_v24 = vadd.f32 %v793_v22, %v338_v18  ;;  %v459_v25 = vpop.f32.mrb[5].mxu0  ;;  %v499_v26 = vpop.f32.mrb[5].mxu1 }
 0x135   : > { %v522_v27 = vadd.f32 %v459_v25, %v329_v19  ;;  %v530_v28 = vadd.f32 %v499_v26, %v337_v20  ;;  %553 = sbr.rel (%p705_p13) target bundleno = 325 (0x145), region = 74  ;;  %v555_v42 = vld [vmem:[#allocation2 + $0x8] sm:$0xff] (!%p705_p13) }
 0x136   : > { %539 = vst [vmem:[#allocation2 + $0x28] sm:$0xff] %v523_v23  ;;  %547 = vst [vmem:[#allocation2 + $0x68] sm:$0xff] %v531_v24  ;;  %v554_v41 = vld [vmem:[#allocation2] sm:$0xff] (!%p705_p13)  ;;  %v563_v50 = vld [vmem:[#allocation2 + $0x48] sm:$0xff] (!%p705_p13) }
 0x137   : > { %538 = vst [vmem:[#allocation2 + $0x20] sm:$0xff] %v522_v27  ;;  %546 = vst [vmem:[#allocation2 + $0x60] sm:$0xff] %v530_v28  ;;  %v784_v33 = vpop.f32.mrb[6].mxu0  ;;  %v796_v34 = vpop.f32.mrb[6].mxu1  ;;  %v562_v49 = vld [vmem:[#allocation2 + $0x40] sm:$0xff] (!%p705_p13) }
 0x138   : > { %v525_v35 = vadd.f32 %v784_v33, %v332_v29  ;;  %v533_v36 = vadd.f32 %v796_v34, %v340_v30  ;;  %v469_v37 = vpop.f32.mrb[7].mxu0  ;;  %v509_v38 = vpop.f32.mrb[7].mxu1  ;;  %570 = vst [vmem:[%s1065_s25] sm:$0xff] (!%p705_p13), %v554_v41  ;;  %571 = vst [vmem:[%s1065_s25 + $0x8] sm:$0xff] (!%p705_p13), %v555_v42 }
 0x139   : > { %v524_v39 = vadd.f32 %v469_v37, %v331_v31  ;;  %v532_v40 = vadd.f32 %v509_v38, %v339_v32  ;;  %v557_v44 = vld [vmem:[#allocation2 + $0x18] sm:$0xff] (!%p705_p13)  ;;  %578 = vst [vmem:[%s1065_s25 + $0x40] sm:$0xff] (!%p705_p13), %v562_v49  ;;  %579 = vst [vmem:[%s1065_s25 + $0x48] sm:$0xff] (!%p705_p13), %v563_v50 }
 0x13a   : > { %541 = vst [vmem:[#allocation2 + $0x38] sm:$0xff] %v525_v35  ;;  %549 = vst [vmem:[#allocation2 + $0x78] sm:$0xff] %v533_v36  ;;  %v556_v43 = vld [vmem:[#allocation2 + $0x10] sm:$0xff] (!%p705_p13)  ;;  %v565_v52 = vld [vmem:[#allocation2 + $0x58] sm:$0xff] (!%p705_p13) }
 0x13b   : > { %540 = vst [vmem:[#allocation2 + $0x30] sm:$0xff] %v524_v39  ;;  %548 = vst [vmem:[#allocation2 + $0x70] sm:$0xff] %v532_v40  ;;  %v564_v51 = vld [vmem:[#allocation2 + $0x50] sm:$0xff] (!%p705_p13) }
 0x13c   : > { %572 = vst [vmem:[%s1065_s25 + $0x10] sm:$0xff] %v556_v43  ;;  %573 = vst [vmem:[%s1065_s25 + $0x18] sm:$0xff] %v557_v44 }
 0x13d   : > { %v559_v46 = vld [vmem:[#allocation2 + $0x28] sm:$0xff]  ;;  %580 = vst [vmem:[%s1065_s25 + $0x50] sm:$0xff] %v564_v51  ;;  %581 = vst [vmem:[%s1065_s25 + $0x58] sm:$0xff] %v565_v52 }
 0x13e   : > { %v558_v45 = vld [vmem:[#allocation2 + $0x20] sm:$0xff]  ;;  %575 = vst [vmem:[%s1065_s25 + $0x28] sm:$0xff] %v559_v46  ;;  %v567_v54 = vld [vmem:[#allocation2 + $0x68] sm:$0xff] }
 0x13f   : > { %574 = vst [vmem:[%s1065_s25 + $0x20] sm:$0xff] %v558_v45  ;;  %v566_v53 = vld [vmem:[#allocation2 + $0x60] sm:$0xff]  ;;  %583 = vst [vmem:[%s1065_s25 + $0x68] sm:$0xff] %v567_v54 }
 0x140   : > { %582 = vst [vmem:[%s1065_s25 + $0x60] sm:$0xff] %v566_v53 }
 0x141   : > { %v561_v48 = vld [vmem:[#allocation2 + $0x38] sm:$0xff] }
 0x142   : > { %v560_v47 = vld [vmem:[#allocation2 + $0x30] sm:$0xff]  ;;  %577 = vst [vmem:[%s1065_s25 + $0x38] sm:$0xff] %v561_v48  ;;  %v569_v56 = vld [vmem:[#allocation2 + $0x78] sm:$0xff] }
 0x143   : > { %576 = vst [vmem:[%s1065_s25 + $0x30] sm:$0xff] %v560_v47  ;;  %v568_v55 = vld [vmem:[#allocation2 + $0x70] sm:$0xff]  ;;  %585 = vst [vmem:[%s1065_s25 + $0x78] sm:$0xff] %v569_v56 }
 0x144   : > { %584 = vst [vmem:[%s1065_s25 + $0x70] sm:$0xff] %v568_v55 }
 0x145 PF: > { %s12_s15 = sadd.s32 1, %s956_s15   ;;  %s1143_s9 = smov %s936_s10 }
 0x146   : > { %p9_p0 = scmp.ge.s32.totalorder %s12_s15, 18   ;;  %s1144_s10 = smov %s1025_s22 }
 0x147   : > { %s1145_s11 = smov %s948_s13  ;;  %s1146_s12 = smov %s952_s14 }
 0x148   : > { %s1147_s13 = smov %s1150_s16  ;;  %s1148_s14 = smov %s1154_s17 }
 0x149   :  { %11 = sbr.rel (!%p9_p0) target bundleno = 4 (0x4), region = 112 }

// kernel: _lambda_.12
= control target key start
LH: loop header
LB: loop body
LE: loop exit
PB: predicated region body
PF: predicated region fallthrough
CT: control target
= control target key end

     0   :  { %s483_s12 = smov 0   ;;  %s485_s13 = smov 0   ;;  %s522_s0 = inlined_call_operand.vmem [shape: f32[2,4,512], index: 0, kind: input, shape index: {}]   ;;  %s523_s1 = inlined_call_operand.vmem [shape: f32[2,4,1], index: 1, kind: input, shape index: {}]   ;;  %s524_s2 = inlined_call_operand.vmem [shape: f32[2,4,1], index: 2, kind: input, shape index: {}]   ;;  %s525_s3 = inlined_call_operand.vmem [shape: f32[2,4,512], index: 3, kind: output, shape index: {}]  }
   0x1   :  { %s487_s14 = smov 0  }
   0x2 LB: > { %s25_s15 = sadd.s32 1, %s455_s13  ;;  %p399_p0 = scmp.ge.s32.totalorder %s459_s14, 1  ;;  %s459_s14 = sphi %s487_s14, %s13_s14   ;;  %s455_s13 = sphi %s485_s13, %s527_s13   ;;  %s451_s12 = sphi %s483_s12, %s526_s12  }
   0x3   : > { %p27_p1 = scmp.ge.s32.totalorder %s25_s15, 2  ;;  %p176_p2 = scmp.lt.s32.totalorder %s459_s14, 3 }
   0x5   : > { %s529_s15 = smov (%p27_p1, %s25_s15), 0  ;;  %p177_p3 = pnand %p399_p0, %p176_p2 }
   0x6   : > { %p217_p4 = scmp.lt.s32.totalorder (!%p177_p3), %s451_s12, 1  ;;  %v461_v0 = vmov (!%p177_p3), 0   ;;  %v462_v3 = vmov (!%p177_p3), 839922192   ;;  %v254_v5 = vlaneseq (!%p177_p3) }
   0x7   : > { %180 = sbr.rel (%p177_p3) target bundleno = 158 (0x9e), region = 32  ;;  %436 = vset.pattern.permute.xlu0 (!%p177_p3), %v461_v0  ;;  %v252_v4 = vunpack.c.l.s4 (!%p177_p3), %v462_v3 }
   0x8   : > { %v255_v7 = vshrl.u32 (!%p177_p3), %v254_v5, 7 }
   0x9   : > { %v253_v6 = vunpack.c.0.s8 (!%p177_p3), %v252_v4 }
   0xb   : > { %v256_v8 = vsub.s32 (!%p177_p3), %v253_v6, %v255_v7 }
   0xe   : > { %s531_s12 = smov (!%p217_p4, %s451_s12), 1 }
   0xf   : > { %s402_s16 = sshll.u32 %s531_s12, 2  ;;  %s408_s23 = sshll.u32 %s531_s12, 4 }
  0x10   : > { %s229_s19 = scalar_lea.vmem %s523_s1, %s402_s16  ;;  %s233_s22 = scalar_lea.vmem %s524_s2, %s402_s16 }
  0x11   : > { %v246_v1 = vld [vmem:[%s229_s19] sm:$0xf]  ;;  %s224_s26 = scalar_lea.vmem %s522_s0, %s408_s23  ;;  %s242_s29 = scalar_lea.vmem %s525_s3, %s408_s23 }
  0x12   : > { %249 = vperm.xlu0 %436, %v246_v1   ;;  %v261_v2 = vld [vmem:[%s233_s22] sm:$0xf]  ;;  %v245_v12 = vld [vmem:[%s224_s26 + $0x8] sm:$0xff] }
  0x13   : > { %v244_v11 = vld [vmem:[%s224_s26] sm:$0xff] }
  0x16   : > { %264 = vperm.xlu0 %436, %v261_v2  }
  0x91   : > { %v250_v9 = vpop.permute.xlu0 %249 }
  0x92   : > { %v257_v10 = vrot.slane %v250_v9, %v256_v8 }
  0x94   : > { %v259_v14 = vmul.f32 %v257_v10, %v244_v11  ;;  %v260_v15 = vmul.f32 %v257_v10, %v245_v12 }
  0x95   : > { %v265_v13 = vpop.permute.xlu0 %264 }
  0x96   : > { %v272_v16 = vrot.slane %v265_v13, %v256_v8 }
  0x98   : > { %v274_v17 = vadd.f32 %v272_v16, %v259_v14  ;;  %v275_v18 = vadd.f32 %v272_v16, %v260_v15 }
  0x9a   : > { %vm276_vm0 = vcmp.ge.f32.partialorder %v274_v17, 0.0  ;;  %vm277_vm1 = vcmp.ge.f32.partialorder %v275_v18, 0.0  ;;  %v278_v19 = vmul.f32 0.25, %v274_v17  ;;  %v279_v20 = vmul.f32 0.25, %v275_v18 }
  0x9c   : > { %v280_v21 = vsel %vm276_vm0, %v274_v17, %v278_v19  ;;  %v281_v22 = vsel %vm277_vm1, %v275_v18, %v279_v20 }
  0x9d   : > { %282 = vst [vmem:[%s242_s29] sm:$0xff] %v280_v21  ;;  %283 = vst [vmem:[%s242_s29 + $0x8] sm:$0xff] %v281_v22 }
  0x9e PF: > { %s13_s14 = sadd.s32 1, %s459_s14   ;;  %s526_s12 = smov %s455_s13 }
  0x9f   : > { %p10_p5 = scmp.ge.s32.totalorder %s13_s14, 4   ;;  %s527_s13 = smov %s529_s15 }
  0xa1   :  { %12 = sbr.rel (!%p10_p5) target bundleno = 2 (0x2), region = 68 }

// kernel: _lambda_.13
= control target key start
LH: loop header
LB: loop body
LE: loop exit
PB: predicated region body
PF: predicated region fallthrough
CT: control target
= control target key end

     0   :  { %7 = vsyncpa [#allocation4], 0  ;;  %s1110_s0 = inlined_call_operand.vmem [shape: f32[1024,128], index: 0, kind: input, shape index: {}]   ;;  %s1111_s1 = inlined_call_operand.vmem [shape: f32[128,128], index: 1, kind: input, shape index: {}]   ;;  %s1112_s2 = inlined_call_operand.hbm [shape: f32[1024,128], index: 2, kind: output, shape index: {}]  }
   0x1   :  { %9 = vsyncpa [#allocation4 + $0x1], 0  ;;  %s907_s9 = smov 0   ;;  %s909_s10 = smov 0  }
   0x2   :  { %s911_s11 = smov 0   ;;  %s913_s12 = smov 0  }
   0x3   :  { %s915_s13 = smov 0   ;;  %s917_s14 = smov 0  }
   0x4 LB: > { %s601_s15 = sadd.s32 4294967295, %s887_s14   ;;  %s602_s16 = sadd.s32 4294967294, %s887_s14   ;;  %s887_s14 = sphi %s917_s14, %s15_s14   ;;  %s883_s13 = sphi %s915_s13, %s1119_s13   ;;  %s879_s12 = sphi %s913_s12, %s1118_s12   ;;  %s875_s11 = sphi %s911_s11, %s1117_s11   ;;  %s871_s10 = sphi %s909_s10, %s1116_s10   ;;  %s867_s9 = sphi %s907_s9, %s1115_s9  }
   0x5   : > { %s34_s17 = sadd.s32 1, %s883_s13  ;;  %s99_s18 = sadd.s32 1, %s875_s11 }
   0x6   : > { %p36_p0 = scmp.ge.s32.totalorder %s34_s17, 8  ;;  %p109_p1 = scmp.ne.s32.totalorder %s875_s11, %s871_s10 }
   0x7   : > { %p110_p2 = scmp.eq.s32.totalorder %s601_s15, 7  ;;  %p115_p3 = scmp.ne.s32.totalorder %s871_s10, %s867_s9 }
   0x8   : > { %s1121_s17 = smov (%p36_p0, %s34_s17), 0  ;;  %p116_p5 = scmp.eq.s32.totalorder %s602_s16, 7 }
   0x9   : > { %p947_p4 = por %p110_p2, %p109_p1  ;;  %s94_s20 = ssub.s32 %s883_s13, %s1121_s17 }
   0xa   : > { %p606_p6 = scmp.ge.s32.totalorder %s887_s14, 1  ;;  %p97_p7 = scmp.eq.s32.totalorder %s94_s20, 0 }
   0xb   : > { %p954_p8 = por %p116_p5, %p115_p3  ;;  %p158_p9 = scmp.lt.s32.totalorder %s887_s14, 9 }
   0xc   : > { %s960_s22 = scalar_select %p97_p7, %s875_s11, %s99_s18  }
   0xd   : > { %p159_p10 = pnand %p606_p6, %p158_p9 }
   0xe   : > { %v262_v0 = vld [vmem:[%s1111_s1] sm:$0xff] (!%p159_p10)  ;;  %v263_v1 = vld [vmem:[%s1111_s1 + $0x8] sm:$0xff] (!%p159_p10)  ;;  %v264_v2 = vld [vmem:[%s1111_s1 + $0x10] sm:$0xff] (!%p159_p10)  ;;  %s608_s29 = sshll.u32 (!%p159_p10), %s879_s12, 4  ;;  %s188_s24 = sand.u32 (!%p159_p10), 1, %s871_s10  }
   0xf   : > { %162 = sbr.rel (%p159_p10) target bundleno = 290 (0x122), region = 28  ;;  %v704_v3 = vpack.c.bf16 (!%p159_p10), %v263_v1, %v262_v0  ;;  %v265_v4 = vld [vmem:[%s1111_s1 + $0x18] sm:$0xff] (!%p159_p10)  ;;  %p192_p11 = scmp.lt.s32.totalorder (!%p159_p10), %s608_s29, 127  ;;  %v266_v6 = vld [vmem:[%s1111_s1 + $0x20] sm:$0xff] (!%p159_p10)  ;;  %v267_v7 = vld [vmem:[%s1111_s1 + $0x28] sm:$0xff] (!%p159_p10) }
  0x10   : > { %v708_v5 = vpack.c.bf16 (!%p159_p10), %v265_v4, %v264_v2  ;;  %v712_v8 = vpack.c.bf16 (!%p159_p10), %v267_v7, %v266_v6  ;;  %v268_v9 = vld [vmem:[%s1111_s1 + $0x30] sm:$0xff] (!%p159_p10)  ;;  %v269_v10 = vld [vmem:[%s1111_s1 + $0x38] sm:$0xff] (!%p159_p10)  ;;  %v270_v14 = vld [vmem:[%s1111_s1 + $0x40] sm:$0xff] (!%p159_p10)  ;;  %s607_s26 = sshll.u32 (!%p159_p10), %s188_s24, 7  ;;  %s889_s5 = smov (!%p159_p10), [#allocation3]  }
  0x11   : > { %705 = vmatprep.subr.bf16.mxu0 (!%p159_p10), %v704_v3  ;;  %736 = vmatprep.subr.bf16.mxu1 (!%p159_p10), %v704_v3  ;;  %v716_v13 = vpack.c.bf16 (!%p159_p10), %v269_v10, %v268_v9  ;;  %v271_v15 = vld [vmem:[%s1111_s1 + $0x48] sm:$0xff] (!%p159_p10)  ;;  %v272_v17 = vld [vmem:[%s1111_s1 + $0x50] sm:$0xff] (!%p159_p10)  ;;  %v273_v18 = vld [vmem:[%s1111_s1 + $0x58] sm:$0xff] (!%p159_p10)  ;;  %s1035_s27 = scalar_lea.vmem (!%p159_p10), [#allocation3], %s607_s26  ;;  %s813_s6 = sshll.u32 (!%p159_p10), %s889_s5, 4  ;;  %s814_s6 = int_to_ptr.vmem [resolvable:$false] %s813_s6 }
  0x12   : > { %707 = vmatpush3.bf16.msra.mxu0 (!%p159_p10), %v704_v3  ;;  %744 = vmatpush3.bf16.msra.mxu1 (!%p159_p10), %v704_v3  ;;  %v720_v16 = vpack.c.bf16 (!%p159_p10), %v271_v15, %v270_v14  ;;  %v724_v19 = vpack.c.bf16 (!%p159_p10), %v273_v18, %v272_v17  ;;  %v274_v20 = vld [vmem:[%s1111_s1 + $0x60] sm:$0xff] (!%p159_p10)  ;;  %v275_v21 = vld [vmem:[%s1111_s1 + $0x68] sm:$0xff] (!%p159_p10)  ;;  %v276_v23 = vld [vmem:[%s1111_s1 + $0x70] sm:$0xff] (!%p159_p10)  ;;  %s505_s28 = sshll.u32 (!%p159_p10), %s1035_s27, 4  ;;  %s815_s7 = scalar_lea.vmem (!%p159_p10), %s814_s6, 4096  ;;  %s1056_s28 = int_to_ptr.vmem [resolvable:$true] %s505_s28 }
  0x13   : > { %709 = vmatprep.subr.bf16.mxu0 (!%p159_p10), %v708_v5  ;;  %737 = vmatprep.subr.bf16.mxu1 (!%p159_p10), %v708_v5  ;;  %v728_v22 = vpack.c.bf16 (!%p159_p10), %v275_v21, %v274_v20  ;;  %v277_v24 = vld [vmem:[%s1111_s1 + $0x78] sm:$0xff] (!%p159_p10)  ;;  %s809_s4 = scalar_lea.vmem (!%p159_p10), %s1056_s28, 2048  ;;  %p816_p1 = scmp.lt.s32.totalorder (!%p159_p10), %s1056_s28, %s814_s6 }
  0x14   : > { %v732_v25 = vpack.c.bf16 (!%p159_p10), %v277_v24, %v276_v23  ;;  %p810_p12 = scmp.ne.s32.totalorder (!%p159_p10), %s1056_s28, %s809_s4  ;;  %p817_p2 = scmp.lt.s32.totalorder (!%p159_p10), %s815_s7, %s809_s4 }
  0x16   : > { %s1123_s29 = smov (!%p192_p11, %s608_s29), 127  ;;  %711 = vmatpush3.bf16.msra.mxu0 %v708_v5  ;;  %745 = vmatpush3.bf16.msra.mxu1 %v708_v5  ;;  %p811_p13 = pnand %p810_p12, %p947_p4 }
  0x17   : > { %s609_s8 = sshll.u32 %s1123_s29, 3  ;;  %713 = vmatprep.subr.bf16.mxu0 %v712_v8  ;;  %738 = vmatprep.subr.bf16.mxu1 %v712_v8  ;;  %p818_p3 = por %p817_p2, %p816_p1 }
  0x18   : > { %s990_s25 = scalar_lea.vmem %s1110_s0, %s609_s8  ;;  %p812_p0 = pneg %p811_p13 }
  0x19   : > { %v246_v11 = vld [vmem:[%s990_s25] sm:$0xff]  ;;  %v247_v26 = vld [vmem:[%s990_s25 + $0x8] sm:$0xff]  ;;  %v248_v28 = vld [vmem:[%s990_s25 + $0x10] sm:$0xff] }
  0x1a   : > { %v254_v12 = vld [vmem:[%s990_s25 + $0x40] sm:$0xff]  ;;  %680 = vmatprep.mubr.f32.mxu0 %v246_v11  ;;  %715 = vmatpush3.bf16.msra.mxu0 %v712_v8  ;;  %v255_v27 = vld [vmem:[%s990_s25 + $0x48] sm:$0xff]  ;;  %v256_v29 = vld [vmem:[%s990_s25 + $0x50] sm:$0xff]  ;;  %p819_p5 = pnand %p818_p3, %p812_p0 }
  0x1b   : > { %692 = vmatprep.mubr.f32.mxu1 %v254_v12  ;;  %746 = vmatpush3.bf16.msra.mxu1 %v712_v8  ;;  %v249_v30 = vld [vmem:[%s990_s25 + $0x18] sm:$0xff]  ;;  %v250_v32 = vld [vmem:[%s990_s25 + $0x20] sm:$0xff]  ;;  %v251_v34 = vld [vmem:[%s990_s25 + $0x28] sm:$0xff] }
  0x1c   : > { %717 = vmatprep.subr.bf16.mxu0 %v716_v13  ;;  %739 = vmatprep.subr.bf16.mxu1 %v716_v13  ;;  %v257_v31 = vld [vmem:[%s990_s25 + $0x58] sm:$0xff]  ;;  %v258_v33 = vld [vmem:[%s990_s25 + $0x60] sm:$0xff]  ;;  %v259_v35 = vld [vmem:[%s990_s25 + $0x68] sm:$0xff] }
  0x1d   : > { %v252_v36 = vld [vmem:[%s990_s25 + $0x30] sm:$0xff]  ;;  %v253_v38 = vld [vmem:[%s990_s25 + $0x38] sm:$0xff] }
  0x1e   : > { %719 = vmatpush3.bf16.msra.mxu0 %v716_v13  ;;  %v260_v37 = vld [vmem:[%s990_s25 + $0x70] sm:$0xff]  ;;  %v261_v39 = vld [vmem:[%s990_s25 + $0x78] sm:$0xff]  ;;  %s615_s25 = sshll.u32 %s879_s12, 11  ;;  %s1064_s12 = scalar_lea.sflag [#allocation4], %s188_s24 }
  0x1f   : > { %747 = vmatpush3.bf16.msra.mxu1 %v716_v13  ;;  %721 = vmatprep.subr.bf16.mxu0 %v720_v16  ;;  %s1054_s3 = scalar_lea.hbm %s1112_s2, %s615_s25 }
  0x20   : > { %740 = vmatprep.subr.bf16.mxu1 %v720_v16 }
  0x22   : > { %723 = vmatpush3.bf16.msra.mxu0 %v720_v16 }
  0x23   : > { %748 = vmatpush3.bf16.msra.mxu1 %v720_v16  ;;  %725 = vmatprep.subr.bf16.mxu0 %v724_v19 }
  0x24   : > { %741 = vmatprep.subr.bf16.mxu1 %v724_v19 }
  0x26   : > { %727 = vmatpush3.bf16.msra.mxu0 %v724_v19 }
  0x27   : > { %749 = vmatpush3.bf16.msra.mxu1 %v724_v19  ;;  %729 = vmatprep.subr.bf16.mxu0 %v728_v22 }
  0x28   : > { %742 = vmatprep.subr.bf16.mxu1 %v728_v22 }
  0x2a   : > { %731 = vmatpush3.bf16.msra.mxu0 %v728_v22 }
  0x2b   : > { %750 = vmatpush3.bf16.msra.mxu1 %v728_v22  ;;  %733 = vmatprep.subr.bf16.mxu0 %v732_v25 }
  0x2c   : > { %743 = vmatprep.subr.bf16.mxu1 %v732_v25 }
  0x2e   : > { %735 = vmatpush3.bf16.msra.mxu0 %v732_v25 }
  0x2f   : > { %751 = vmatpush3.bf16.msra.mxu1 %v732_v25 }
  0x31   : > { %681 = vmatmul.mubr.f32.vlgmr.msra.gmra.mrb[0].mxu0 %v247_v26 }
  0x32   : > { %693 = vmatmul.mubr.f32.vlgmr.msra.gmra.mrb[0].mxu1 %v255_v27  ;;  %683 = vmatprep.mubr.f32.mxu0 %v248_v28 }
  0x33   : > { %695 = vmatprep.mubr.f32.mxu1 %v256_v29 }
  0x35   : > { %684 = vmatmul.mubr.f32.gmra.mrb[2].mxu0 %v249_v30 }
  0x36   : > { %696 = vmatmul.mubr.f32.gmra.mrb[2].mxu1 %v257_v31  ;;  %686 = vmatprep.mubr.f32.mxu0 %v250_v32 }
  0x37   : > { %698 = vmatprep.mubr.f32.mxu1 %v258_v33 }
  0x39   : > { %687 = vmatmul.mubr.f32.gmra.mrb[4].mxu0 %v251_v34 }
  0x3a   : > { %699 = vmatmul.mubr.f32.gmra.mrb[4].mxu1 %v259_v35  ;;  %689 = vmatprep.mubr.f32.mxu0 %v252_v36 }
  0x3b   : > { %701 = vmatprep.mubr.f32.mxu1 %v260_v37 }
  0x3d   : > { %690 = vmatmul.mubr.f32.gmra.mrb[6].mxu0 %v253_v38 }
  0x3e   : > { %702 = vmatmul.mubr.f32.gmra.mrb[6].mxu1 %v261_v39 }
 0x104   : > { %v682_v40 = vpop.f32.mrb[0].mxu0 }
 0x105   : > { %v694_v41 = vpop.f32.mrb[0].mxu1  ;;  %475 = vst [vmem:[%s1035_s27 + $0x8] sm:$0xff] %v682_v40  ;;  %v344_v42 = vpop.f32.mrb[1].mxu0 }
 0x106   : > { %483 = vst [vmem:[%s1035_s27 + $0x48] sm:$0xff] %v694_v41  ;;  %v384_v43 = vpop.f32.mrb[1].mxu1  ;;  %474 = vst [vmem:[%s1035_s27] sm:$0xff] %v344_v42 }
 0x107   : > { %482 = vst [vmem:[%s1035_s27 + $0x40] sm:$0xff] %v384_v43 }
 0x108   : > { %v685_v44 = vpop.f32.mrb[2].mxu0 }
 0x109   : > { %v697_v45 = vpop.f32.mrb[2].mxu1  ;;  %477 = vst [vmem:[%s1035_s27 + $0x18] sm:$0xff] %v685_v44  ;;  %v354_v46 = vpop.f32.mrb[3].mxu0 }
 0x10a   : > { %485 = vst [vmem:[%s1035_s27 + $0x58] sm:$0xff] %v697_v45  ;;  %v394_v47 = vpop.f32.mrb[3].mxu1  ;;  %476 = vst [vmem:[%s1035_s27 + $0x10] sm:$0xff] %v354_v46 }
 0x10b   : > { %484 = vst [vmem:[%s1035_s27 + $0x50] sm:$0xff] %v394_v47 }
 0x10c   : > { %v688_v48 = vpop.f32.mrb[4].mxu0 }
 0x10d   : > { %v700_v49 = vpop.f32.mrb[4].mxu1  ;;  %479 = vst [vmem:[%s1035_s27 + $0x28] sm:$0xff] %v688_v48  ;;  %v364_v50 = vpop.f32.mrb[5].mxu0 }
 0x10e   : > { %487 = vst [vmem:[%s1035_s27 + $0x68] sm:$0xff] %v700_v49  ;;  %v404_v51 = vpop.f32.mrb[5].mxu1  ;;  %478 = vst [vmem:[%s1035_s27 + $0x20] sm:$0xff] %v364_v50 }
 0x10f   : > { %486 = vst [vmem:[%s1035_s27 + $0x60] sm:$0xff] %v404_v51 }
 0x110   : > { %v691_v52 = vpop.f32.mrb[6].mxu0 }
 0x111   : > { %v703_v53 = vpop.f32.mrb[6].mxu1  ;;  %481 = vst [vmem:[%s1035_s27 + $0x38] sm:$0xff] %v691_v52  ;;  %v374_v54 = vpop.f32.mrb[7].mxu0 }
 0x112   : > { %489 = vst [vmem:[%s1035_s27 + $0x78] sm:$0xff] %v703_v53  ;;  %v414_v55 = vpop.f32.mrb[7].mxu1  ;;  %480 = vst [vmem:[%s1035_s27 + $0x30] sm:$0xff] %v374_v54 }
 0x113   : > { %488 = vst [vmem:[%s1035_s27 + $0x70] sm:$0xff] %v414_v55 }
 0x114   : > { %822 = shalt.err (!%p819_p5)
}
 0x115   : > { %s823_s8 = scalar_lea.hbm %s1054_s3, 2048  ;;  %s827_s18 = scalar_lea.hbm %s1112_s2, 16384 }
 0x116   : > { %p824_p6 = scmp.ne.s32.totalorder %s1054_s3, %s823_s8  ;;  %p828_p10 = scmp.lt.u32.totalorder %s1054_s3, %s1112_s2 }
 0x117   : > { %p829_p11 = scmp.lt.u32.totalorder %s827_s18, %s823_s8  ;;  %p831_p13 = scmp.lt.u32.totalorder %s823_s8, %s1054_s3 }
 0x118   : > { %p825_p7 = pnand %p824_p6, %p947_p4 }
 0x119   : > { %p830_p12 = por %p829_p11, %p828_p10 }
 0x11a   : > { %p826_p9 = pneg %p825_p7 }
 0x11b   : > { %p832_p0 = por %p831_p13, %p830_p12 }
 0x11d   : > { %p833_p1 = pnand %p832_p0, %p826_p9 }
 0x11f   : > { %836 = shalt.err (!%p833_p1)
}
 0x120   : > { %s890_s24 = smov 128   ;;  %s891_s26 = smov 8  }
 0x121   : > { %752 = dma.vmem_to_hbm [thread:$0]  (%p947_p4), %s1056_s28, 2048, %s1054_s3, %s1064_s12, %s890_s24, %s890_s24, %s891_s26  }
 0x122 PF: > { %p758_p2 = scmp.ge.s32.totalorder %s887_s14, 2  ;;  %s520_s27 = sand.u32 1, %s867_s9  }
 0x123   : > { %s521_s25 = scalar_lea.sflag [#allocation4], %s520_s27 }
 0x124   : > { %p755_p3 = pnand %p758_p2, %p954_p8 }
 0x126   : > { %862 = dma.done.wait (!%p755_p3), %s521_s25, 2048  }
 0x127   : > { %864 = vsyncadd (!%p755_p3), %s521_s25, 4294965248  ;;  %s15_s14 = sadd.s32 1, %s887_s14   ;;  %s1115_s9 = smov %s871_s10 }
 0x128   : > { %p12_p5 = scmp.ge.s32.totalorder %s15_s14, 10   ;;  %s1116_s10 = smov %s875_s11 }
 0x129   : > { %s1117_s11 = smov %s960_s22  ;;  %s1118_s12 = smov %s883_s13 }
 0x12a   : > { %s1119_s13 = smov %s1121_s17  ;;  %14 = sbr.rel (!%p12_p5) target bundleno = 4 (0x4), region = 74 }
 0x131   :  { %526 = vsyncpa [#allocation4], 1 }
 0x132   :  { %528 = vsyncpa [#allocation4 + $0x1], 1 }

// kernel: _lambda_.15
= control target key start
LH: loop header
LB: loop body
LE: loop exit
PB: predicated region body
PF: predicated region fallthrough
CT: control target
= control target key end

     0   :  { %s808_s9 = smov 0   ;;  %s810_s10 = smov 0   ;;  %s932_s0 = inlined_call_operand.vmem [shape: f32[1024,128], index: 0, kind: input, shape index: {}]   ;;  %s933_s1 = inlined_call_operand.vmem [shape: f32[128,128], index: 1, kind: input, shape index: {}]   ;;  %s934_s2 = inlined_call_operand.vmem [shape: f32[1024,128], index: 2, kind: output, shape index: {}]  }
   0x1   :  { %s812_s11 = smov 0  }
   0x2 LB: > { %s31_s12 = sadd.s32 1, %s787_s10  ;;  %p602_p0 = scmp.ge.s32.totalorder %s791_s11, 1  ;;  %s791_s11 = sphi %s812_s11, %s12_s11   ;;  %s787_s10 = sphi %s810_s10, %s936_s10   ;;  %s783_s9 = sphi %s808_s9, %s935_s9  }
   0x3   : > { %p33_p1 = scmp.ge.s32.totalorder %s31_s12, 8  ;;  %p155_p2 = scmp.lt.s32.totalorder %s791_s11, 9 }
   0x5   : > { %s938_s12 = smov (%p33_p1, %s31_s12), 0  ;;  %p156_p3 = pnand %p602_p0, %p155_p2 }
   0x6   : > { %v270_v0 = vld [vmem:[%s933_s1] sm:$0xff] (!%p156_p3)  ;;  %v271_v1 = vld [vmem:[%s933_s1 + $0x8] sm:$0xff] (!%p156_p3)  ;;  %v272_v2 = vld [vmem:[%s933_s1 + $0x10] sm:$0xff] (!%p156_p3)  ;;  %s603_s19 = sshll.u32 (!%p156_p3), %s783_s9, 4 }
   0x7   : > { %159 = sbr.rel (%p156_p3) target bundleno = 268 (0x10c), region = 28  ;;  %v697_v3 = vpack.c.bf16 (!%p156_p3), %v271_v1, %v270_v0  ;;  %v273_v4 = vld [vmem:[%s933_s1 + $0x18] sm:$0xff] (!%p156_p3)  ;;  %p192_p4 = scmp.lt.s32.totalorder (!%p156_p3), %s603_s19, 127  ;;  %v274_v6 = vld [vmem:[%s933_s1 + $0x20] sm:$0xff] (!%p156_p3)  ;;  %v275_v7 = vld [vmem:[%s933_s1 + $0x28] sm:$0xff] (!%p156_p3) }
   0x8   : > { %v701_v5 = vpack.c.bf16 (!%p156_p3), %v273_v4, %v272_v2  ;;  %v705_v8 = vpack.c.bf16 (!%p156_p3), %v275_v7, %v274_v6  ;;  %v276_v9 = vld [vmem:[%s933_s1 + $0x30] sm:$0xff] (!%p156_p3)  ;;  %v277_v10 = vld [vmem:[%s933_s1 + $0x38] sm:$0xff] (!%p156_p3)  ;;  %v278_v14 = vld [vmem:[%s933_s1 + $0x40] sm:$0xff] (!%p156_p3) }
   0x9   : > { %698 = vmatprep.subr.bf16.mxu0 (!%p156_p3), %v697_v3  ;;  %729 = vmatprep.subr.bf16.mxu1 (!%p156_p3), %v697_v3  ;;  %v709_v13 = vpack.c.bf16 (!%p156_p3), %v277_v10, %v276_v9  ;;  %v279_v15 = vld [vmem:[%s933_s1 + $0x48] sm:$0xff] (!%p156_p3)  ;;  %v280_v17 = vld [vmem:[%s933_s1 + $0x50] sm:$0xff] (!%p156_p3)  ;;  %v281_v18 = vld [vmem:[%s933_s1 + $0x58] sm:$0xff] (!%p156_p3) }
   0xa   : > { %700 = vmatpush3.bf16.msra.mxu0 (!%p156_p3), %v697_v3  ;;  %737 = vmatpush3.bf16.msra.mxu1 (!%p156_p3), %v697_v3  ;;  %v713_v16 = vpack.c.bf16 (!%p156_p3), %v279_v15, %v278_v14  ;;  %v717_v19 = vpack.c.bf16 (!%p156_p3), %v281_v18, %v280_v17  ;;  %v282_v20 = vld [vmem:[%s933_s1 + $0x60] sm:$0xff] (!%p156_p3)  ;;  %v283_v21 = vld [vmem:[%s933_s1 + $0x68] sm:$0xff] (!%p156_p3)  ;;  %v284_v23 = vld [vmem:[%s933_s1 + $0x70] sm:$0xff] (!%p156_p3) }
   0xb   : > { %702 = vmatprep.subr.bf16.mxu0 (!%p156_p3), %v701_v5  ;;  %730 = vmatprep.subr.bf16.mxu1 (!%p156_p3), %v701_v5  ;;  %v721_v22 = vpack.c.bf16 (!%p156_p3), %v283_v21, %v282_v20  ;;  %v285_v24 = vld [vmem:[%s933_s1 + $0x78] sm:$0xff] (!%p156_p3) }
   0xc   : > { %v725_v25 = vpack.c.bf16 (!%p156_p3), %v285_v24, %v284_v23 }
   0xe   : > { %s940_s19 = smov (!%p192_p4, %s603_s19), 127  ;;  %704 = vmatpush3.bf16.msra.mxu0 %v701_v5  ;;  %738 = vmatpush3.bf16.msra.mxu1 %v701_v5 }
   0xf   : > { %s604_s26 = sshll.u32 %s940_s19, 3  ;;  %706 = vmatprep.subr.bf16.mxu0 %v705_v8  ;;  %731 = vmatprep.subr.bf16.mxu1 %v705_v8 }
  0x10   : > { %s858_s5 = scalar_lea.vmem %s932_s0, %s604_s26  ;;  %s905_s29 = scalar_lea.vmem %s934_s2, %s604_s26 }
  0x11   : > { %v254_v11 = vld [vmem:[%s858_s5] sm:$0xff]  ;;  %v255_v26 = vld [vmem:[%s858_s5 + $0x8] sm:$0xff]  ;;  %v256_v28 = vld [vmem:[%s858_s5 + $0x10] sm:$0xff] }
  0x12   : > { %v262_v12 = vld [vmem:[%s858_s5 + $0x40] sm:$0xff]  ;;  %673 = vmatprep.mubr.f32.mxu0 %v254_v11  ;;  %708 = vmatpush3.bf16.msra.mxu0 %v705_v8  ;;  %v263_v27 = vld [vmem:[%s858_s5 + $0x48] sm:$0xff]  ;;  %v264_v29 = vld [vmem:[%s858_s5 + $0x50] sm:$0xff] }
  0x13   : > { %685 = vmatprep.mubr.f32.mxu1 %v262_v12  ;;  %739 = vmatpush3.bf16.msra.mxu1 %v705_v8  ;;  %v257_v30 = vld [vmem:[%s858_s5 + $0x18] sm:$0xff]  ;;  %v258_v32 = vld [vmem:[%s858_s5 + $0x20] sm:$0xff]  ;;  %v259_v34 = vld [vmem:[%s858_s5 + $0x28] sm:$0xff] }
  0x14   : > { %710 = vmatprep.subr.bf16.mxu0 %v709_v13  ;;  %732 = vmatprep.subr.bf16.mxu1 %v709_v13  ;;  %v265_v31 = vld [vmem:[%s858_s5 + $0x58] sm:$0xff]  ;;  %v266_v33 = vld [vmem:[%s858_s5 + $0x60] sm:$0xff]  ;;  %v267_v35 = vld [vmem:[%s858_s5 + $0x68] sm:$0xff] }
  0x15   : > { %v260_v36 = vld [vmem:[%s858_s5 + $0x30] sm:$0xff]  ;;  %v261_v38 = vld [vmem:[%s858_s5 + $0x38] sm:$0xff] }
  0x16   : > { %712 = vmatpush3.bf16.msra.mxu0 %v709_v13  ;;  %v268_v37 = vld [vmem:[%s858_s5 + $0x70] sm:$0xff]  ;;  %v269_v39 = vld [vmem:[%s858_s5 + $0x78] sm:$0xff] }
  0x17   : > { %740 = vmatpush3.bf16.msra.mxu1 %v709_v13  ;;  %714 = vmatprep.subr.bf16.mxu0 %v713_v16 }
  0x18   : > { %733 = vmatprep.subr.bf16.mxu1 %v713_v16 }
  0x1a   : > { %716 = vmatpush3.bf16.msra.mxu0 %v713_v16 }
  0x1b   : > { %741 = vmatpush3.bf16.msra.mxu1 %v713_v16  ;;  %718 = vmatprep.subr.bf16.mxu0 %v717_v19 }
  0x1c   : > { %734 = vmatprep.subr.bf16.mxu1 %v717_v19 }
  0x1e   : > { %720 = vmatpush3.bf16.msra.mxu0 %v717_v19 }
  0x1f   : > { %742 = vmatpush3.bf16.msra.mxu1 %v717_v19  ;;  %722 = vmatprep.subr.bf16.mxu0 %v721_v22 }
  0x20   : > { %735 = vmatprep.subr.bf16.mxu1 %v721_v22 }
  0x22   : > { %724 = vmatpush3.bf16.msra.mxu0 %v721_v22 }
  0x23   : > { %743 = vmatpush3.bf16.msra.mxu1 %v721_v22  ;;  %726 = vmatprep.subr.bf16.mxu0 %v725_v25 }
  0x24   : > { %736 = vmatprep.subr.bf16.mxu1 %v725_v25 }
  0x26   : > { %728 = vmatpush3.bf16.msra.mxu0 %v725_v25 }
  0x27   : > { %744 = vmatpush3.bf16.msra.mxu1 %v725_v25 }
  0x29   : > { %674 = vmatmul.mubr.f32.vlgmr.msra.gmra.mrb[0].mxu0 %v255_v26 }
  0x2a   : > { %686 = vmatmul.mubr.f32.vlgmr.msra.gmra.mrb[0].mxu1 %v263_v27  ;;  %676 = vmatprep.mubr.f32.mxu0 %v256_v28 }
  0x2b   : > { %688 = vmatprep.mubr.f32.mxu1 %v264_v29 }
  0x2d   : > { %677 = vmatmul.mubr.f32.gmra.mrb[2].mxu0 %v257_v30 }
  0x2e   : > { %689 = vmatmul.mubr.f32.gmra.mrb[2].mxu1 %v265_v31  ;;  %679 = vmatprep.mubr.f32.mxu0 %v258_v32 }
  0x2f   : > { %691 = vmatprep.mubr.f32.mxu1 %v266_v33 }
  0x31   : > { %680 = vmatmul.mubr.f32.gmra.mrb[4].mxu0 %v259_v34 }
  0x32   : > { %692 = vmatmul.mubr.f32.gmra.mrb[4].mxu1 %v267_v35  ;;  %682 = vmatprep.mubr.f32.mxu0 %v260_v36 }
  0x33   : > { %694 = vmatprep.mubr.f32.mxu1 %v268_v37 }
  0x35   : > { %683 = vmatmul.mubr.f32.gmra.mrb[6].mxu0 %v261_v38 }
  0x36   : > { %695 = vmatmul.mubr.f32.gmra.mrb[6].mxu1 %v269_v39 }
  0xfc   : > { %v675_v40 = vpop.f32.mrb[0].mxu0 }
  0xfd   : > { %v687_v41 = vpop.f32.mrb[0].mxu1  ;;  %483 = vst [vmem:[%s905_s29 + $0x8] sm:$0xff] %v675_v40  ;;  %v352_v42 = vpop.f32.mrb[1].mxu0 }
  0xfe   : > { %491 = vst [vmem:[%s905_s29 + $0x48] sm:$0xff] %v687_v41  ;;  %v392_v43 = vpop.f32.mrb[1].mxu1  ;;  %482 = vst [vmem:[%s905_s29] sm:$0xff] %v352_v42 }
  0xff   : > { %490 = vst [vmem:[%s905_s29 + $0x40] sm:$0xff] %v392_v43 }
 0x100   : > { %v678_v44 = vpop.f32.mrb[2].mxu0 }
 0x101   : > { %v690_v45 = vpop.f32.mrb[2].mxu1  ;;  %485 = vst [vmem:[%s905_s29 + $0x18] sm:$0xff] %v678_v44  ;;  %v362_v46 = vpop.f32.mrb[3].mxu0 }
 0x102   : > { %493 = vst [vmem:[%s905_s29 + $0x58] sm:$0xff] %v690_v45  ;;  %v402_v47 = vpop.f32.mrb[3].mxu1  ;;  %484 = vst [vmem:[%s905_s29 + $0x10] sm:$0xff] %v362_v46 }
 0x103   : > { %492 = vst [vmem:[%s905_s29 + $0x50] sm:$0xff] %v402_v47 }
 0x104   : > { %v681_v48 = vpop.f32.mrb[4].mxu0 }
 0x105   : > { %v693_v49 = vpop.f32.mrb[4].mxu1  ;;  %487 = vst [vmem:[%s905_s29 + $0x28] sm:$0xff] %v681_v48  ;;  %v372_v50 = vpop.f32.mrb[5].mxu0 }
 0x106   : > { %495 = vst [vmem:[%s905_s29 + $0x68] sm:$0xff] %v693_v49  ;;  %v412_v51 = vpop.f32.mrb[5].mxu1  ;;  %486 = vst [vmem:[%s905_s29 + $0x20] sm:$0xff] %v372_v50 }
 0x107   : > { %494 = vst [vmem:[%s905_s29 + $0x60] sm:$0xff] %v412_v51 }
 0x108   : > { %v684_v52 = vpop.f32.mrb[6].mxu0 }
 0x109   : > { %v696_v53 = vpop.f32.mrb[6].mxu1  ;;  %489 = vst [vmem:[%s905_s29 + $0x38] sm:$0xff] %v684_v52  ;;  %v382_v54 = vpop.f32.mrb[7].mxu0 }
 0x10a   : > { %497 = vst [vmem:[%s905_s29 + $0x78] sm:$0xff] %v696_v53  ;;  %v422_v55 = vpop.f32.mrb[7].mxu1  ;;  %488 = vst [vmem:[%s905_s29 + $0x30] sm:$0xff] %v382_v54 }
 0x10b   : > { %496 = vst [vmem:[%s905_s29 + $0x70] sm:$0xff] %v422_v55 }
 0x10c PF: > { %s12_s11 = sadd.s32 1, %s791_s11   ;;  %s935_s9 = smov %s787_s10 }
 0x10d   : > { %p9_p5 = scmp.ge.s32.totalorder %s12_s11, 10   ;;  %s936_s10 = smov %s938_s12 }
 0x10f   :  { %11 = sbr.rel (!%p9_p5) target bundleno = 2 (0x2), region = 69 }

// kernel: _lambda_.18
= control target key start
LH: loop header
LB: loop body
LE: loop exit
PB: predicated region body
PF: predicated region fallthrough
CT: control target
= control target key end

     0   :  { %s576_s15 = smov 0   ;;  %s578_s16 = smov 0   ;;  %s618_s0 = inlined_call_operand.vmem [shape: f32[2,4,512], index: 0, kind: input, shape index: {}]   ;;  %s619_s1 = inlined_call_operand.vmem [shape: f32[2,4,1], index: 1, kind: input, shape index: {}]   ;;  %s620_s2 = inlined_call_operand.vmem [shape: f32[2,4,1], index: 2, kind: input, shape index: {}]   ;;  %s621_s3 = inlined_call_operand.vmem [shape: f32[2,4,512], index: 3, kind: input, shape index: {}]   ;;  %s622_s4 = inlined_call_operand.vmem [shape: f32[2,4,512], index: 4, kind: output, shape index: {}]  }
   0x1   :  { %s580_s17 = smov 0  }
   0x2 LB: > { %s26_s18 = sadd.s32 1, %s543_s16  ;;  %p484_p0 = scmp.ge.s32.totalorder %s547_s17, 1  ;;  %s547_s17 = sphi %s580_s17, %s14_s17   ;;  %s543_s16 = sphi %s578_s16, %s624_s16   ;;  %s539_s15 = sphi %s576_s15, %s623_s15  }
   0x3   : > { %p28_p1 = scmp.ge.s32.totalorder %s26_s18, 2  ;;  %p218_p2 = scmp.lt.s32.totalorder %s547_s17, 3 }
   0x5   : > { %s626_s18 = smov (%p28_p1, %s26_s18), 0  ;;  %p219_p3 = pnand %p484_p0, %p218_p2 }
   0x6   : > { %p270_p4 = scmp.lt.s32.totalorder (!%p219_p3), %s539_s15, 1  ;;  %v549_v0 = vmov (!%p219_p3), 0   ;;  %v550_v3 = vmov (!%p219_p3), 839922192   ;;  %v317_v5 = vlaneseq (!%p219_p3) }
   0x7   : > { %222 = sbr.rel (%p219_p3) target bundleno = 160 (0xa0), region = 36  ;;  %524 = vset.pattern.permute.xlu0 (!%p219_p3), %v549_v0  ;;  %v315_v4 = vunpack.c.l.s4 (!%p219_p3), %v550_v3 }
   0x8   : > { %v318_v7 = vshrl.u32 (!%p219_p3), %v317_v5, 7 }
   0x9   : > { %v316_v6 = vunpack.c.0.s8 (!%p219_p3), %v315_v4 }
   0xb   : > { %v319_v8 = vsub.s32 (!%p219_p3), %v316_v6, %v318_v7 }
   0xe   : > { %s628_s15 = smov (!%p270_p4, %s539_s15), 1 }
   0xf   : > { %s487_s19 = sshll.u32 %s628_s15, 2  ;;  %s495_s26 = sshll.u32 %s628_s15, 4 }
  0x10   : > { %s282_s22 = scalar_lea.vmem %s619_s1, %s487_s19  ;;  %s286_s25 = scalar_lea.vmem %s620_s2, %s487_s19 }
  0x11   : > { %v309_v1 = vld [vmem:[%s282_s22] sm:$0xf]  ;;  %s277_s29 = scalar_lea.vmem %s618_s0, %s495_s26  ;;  %s295_s6 = scalar_lea.vmem %s621_s3, %s495_s26 }
  0x12   : > { %312 = vperm.xlu0 %524, %v309_v1   ;;  %v324_v2 = vld [vmem:[%s286_s25] sm:$0xf]  ;;  %v308_v12 = vld [vmem:[%s277_s29 + $0x8] sm:$0xff]  ;;  %s305_s9 = scalar_lea.vmem %s622_s4, %s495_s26 }
  0x13   : > { %v307_v11 = vld [vmem:[%s277_s29] sm:$0xff]  ;;  %v346_v22 = vld [vmem:[%s295_s6 + $0x8] sm:$0xff] }
  0x14   : > { %v345_v21 = vld [vmem:[%s295_s6] sm:$0xff] }
  0x16   : > { %327 = vperm.xlu0 %524, %v324_v2  }
  0x91   : > { %v313_v9 = vpop.permute.xlu0 %312 }
  0x92   : > { %v320_v10 = vrot.slane %v313_v9, %v319_v8 }
  0x94   : > { %v322_v14 = vmul.f32 %v320_v10, %v307_v11  ;;  %v323_v15 = vmul.f32 %v320_v10, %v308_v12 }
  0x95   : > { %v328_v13 = vpop.permute.xlu0 %327 }
  0x96   : > { %v335_v16 = vrot.slane %v328_v13, %v319_v8 }
  0x98   : > { %v337_v17 = vadd.f32 %v335_v16, %v322_v14  ;;  %v338_v18 = vadd.f32 %v335_v16, %v323_v15 }
  0x9a   : > { %vm339_vm0 = vcmp.ge.f32.partialorder %v337_v17, 0.0  ;;  %vm340_vm1 = vcmp.ge.f32.partialorder %v338_v18, 0.0  ;;  %v341_v19 = vmul.f32 0.25, %v337_v17  ;;  %v342_v20 = vmul.f32 0.25, %v338_v18 }
  0x9c   : > { %v343_v23 = vsel %vm339_vm0, %v337_v17, %v341_v19  ;;  %v344_v24 = vsel %vm340_vm1, %v338_v18, %v342_v20 }
  0x9d   : > { %v347_v25 = vadd.f32 %v345_v21, %v343_v23  ;;  %v348_v26 = vadd.f32 %v346_v22, %v344_v24 }
  0x9f   : > { %349 = vst [vmem:[%s305_s9] sm:$0xff] %v347_v25  ;;  %350 = vst [vmem:[%s305_s9 + $0x8] sm:$0xff] %v348_v26 }
  0xa0 PF: > { %s14_s17 = sadd.s32 1, %s547_s17   ;;  %s623_s15 = smov %s543_s16 }
  0xa1   : > { %p11_p5 = scmp.ge.s32.totalorder %s14_s17, 4   ;;  %s624_s16 = smov %s626_s18 }
  0xa3   :  { %13 = sbr.rel (!%p11_p5) target bundleno = 2 (0x2), region = 75 }

// kernel: _lambda_.19
= control target key start
LH: loop header
LB: loop body
LE: loop exit
PB: predicated region body
PF: predicated region fallthrough
CT: control target
= control target key end

     0   :  { %s590_s1 = inlined_call_operand.vmem [shape: f32[128,128], index: 1, kind: input, shape index: {}]   ;;  %s591_s0 = inlined_call_operand.vmem [shape: f32[128,128], index: 0, kind: input, shape index: {}]   ;;  %s592_s2 = inlined_call_operand.vmem [shape: f32[128,128], index: 2, kind: output, shape index: {}]  }
   0x1   :  { %v63_v0 = vld [vmem:[%s590_s1] sm:$0xff]  ;;  %v64_v1 = vld [vmem:[%s590_s1 + $0x8] sm:$0xff]  ;;  %v65_v2 = vld [vmem:[%s590_s1 + $0x10] sm:$0xff] }
   0x2   :  { %v383_v3 = vpack.c.bf16 %v64_v1, %v63_v0  ;;  %v66_v4 = vld [vmem:[%s590_s1 + $0x18] sm:$0xff]  ;;  %v67_v6 = vld [vmem:[%s590_s1 + $0x20] sm:$0xff]  ;;  %v68_v7 = vld [vmem:[%s590_s1 + $0x28] sm:$0xff] }
   0x3   :  { %v387_v5 = vpack.c.bf16 %v66_v4, %v65_v2  ;;  %v391_v8 = vpack.c.bf16 %v68_v7, %v67_v6  ;;  %v47_v9 = vld [vmem:[%s591_s0] sm:$0xff]  ;;  %v69_v11 = vld [vmem:[%s590_s1 + $0x30] sm:$0xff]  ;;  %v70_v12 = vld [vmem:[%s590_s1 + $0x38] sm:$0xff] }
   0x4   :  { %384 = vmatprep.subr.bf16.mxu0 %v383_v3  ;;  %415 = vmatprep.subr.bf16.mxu1 %v383_v3  ;;  %v55_v10 = vld [vmem:[%s591_s0 + $0x40] sm:$0xff]  ;;  %v395_v13 = vpack.c.bf16 %v70_v12, %v69_v11  ;;  %v72_v15 = vld [vmem:[%s590_s1 + $0x48] sm:$0xff]  ;;  %v73_v17 = vld [vmem:[%s590_s1 + $0x50] sm:$0xff] }
   0x5   :  { %386 = vmatpush3.bf16.msra.mxu0 %v383_v3  ;;  %423 = vmatpush3.bf16.msra.mxu1 %v383_v3  ;;  %v71_v14 = vld [vmem:[%s590_s1 + $0x40] sm:$0xff]  ;;  %v74_v18 = vld [vmem:[%s590_s1 + $0x58] sm:$0xff]  ;;  %v76_v21 = vld [vmem:[%s590_s1 + $0x68] sm:$0xff] }
   0x6   :  { %388 = vmatprep.subr.bf16.mxu0 %v387_v5  ;;  %416 = vmatprep.subr.bf16.mxu1 %v387_v5  ;;  %v399_v16 = vpack.c.bf16 %v72_v15, %v71_v14  ;;  %v403_v19 = vpack.c.bf16 %v74_v18, %v73_v17  ;;  %v75_v20 = vld [vmem:[%s590_s1 + $0x60] sm:$0xff]  ;;  %v77_v23 = vld [vmem:[%s590_s1 + $0x70] sm:$0xff]  ;;  %v78_v24 = vld [vmem:[%s590_s1 + $0x78] sm:$0xff] }
   0x7   :  { %359 = vmatprep.mubr.f32.mxu0 %v47_v9  ;;  %371 = vmatprep.mubr.f32.mxu1 %v55_v10  ;;  %v407_v22 = vpack.c.bf16 %v76_v21, %v75_v20  ;;  %v411_v25 = vpack.c.bf16 %v78_v24, %v77_v23  ;;  %v48_v26 = vld [vmem:[%s591_s0 + $0x8] sm:$0xff]  ;;  %v49_v28 = vld [vmem:[%s591_s0 + $0x10] sm:$0xff]  ;;  %v50_v30 = vld [vmem:[%s591_s0 + $0x18] sm:$0xff] }
   0x8   :  { %v56_v27 = vld [vmem:[%s591_s0 + $0x48] sm:$0xff]  ;;  %v57_v29 = vld [vmem:[%s591_s0 + $0x50] sm:$0xff]  ;;  %v58_v31 = vld [vmem:[%s591_s0 + $0x58] sm:$0xff] }
   0x9   :  { %390 = vmatpush3.bf16.msra.mxu0 %v387_v5  ;;  %424 = vmatpush3.bf16.msra.mxu1 %v387_v5  ;;  %v51_v32 = vld [vmem:[%s591_s0 + $0x20] sm:$0xff]  ;;  %v52_v34 = vld [vmem:[%s591_s0 + $0x28] sm:$0xff]  ;;  %v53_v36 = vld [vmem:[%s591_s0 + $0x30] sm:$0xff] }
   0xa   :  { %392 = vmatprep.subr.bf16.mxu0 %v391_v8  ;;  %417 = vmatprep.subr.bf16.mxu1 %v391_v8  ;;  %v59_v33 = vld [vmem:[%s591_s0 + $0x60] sm:$0xff]  ;;  %v60_v35 = vld [vmem:[%s591_s0 + $0x68] sm:$0xff]  ;;  %v61_v37 = vld [vmem:[%s591_s0 + $0x70] sm:$0xff] }
   0xb   :  { %v54_v38 = vld [vmem:[%s591_s0 + $0x38] sm:$0xff] }
   0xc   :  { %v62_v39 = vld [vmem:[%s591_s0 + $0x78] sm:$0xff] }
   0xd   :  { %394 = vmatpush3.bf16.msra.mxu0 %v391_v8  ;;  %425 = vmatpush3.bf16.msra.mxu1 %v391_v8 }
   0xe   :  { %396 = vmatprep.subr.bf16.mxu0 %v395_v13  ;;  %418 = vmatprep.subr.bf16.mxu1 %v395_v13 }
  0x11   :  { %398 = vmatpush3.bf16.msra.mxu0 %v395_v13  ;;  %426 = vmatpush3.bf16.msra.mxu1 %v395_v13 }
  0x12   :  { %400 = vmatprep.subr.bf16.mxu0 %v399_v16  ;;  %419 = vmatprep.subr.bf16.mxu1 %v399_v16 }
  0x15   :  { %402 = vmatpush3.bf16.msra.mxu0 %v399_v16  ;;  %427 = vmatpush3.bf16.msra.mxu1 %v399_v16 }
  0x16   :  { %404 = vmatprep.subr.bf16.mxu0 %v403_v19  ;;  %420 = vmatprep.subr.bf16.mxu1 %v403_v19 }
  0x19   :  { %406 = vmatpush3.bf16.msra.mxu0 %v403_v19  ;;  %428 = vmatpush3.bf16.msra.mxu1 %v403_v19 }
  0x1a   :  { %408 = vmatprep.subr.bf16.mxu0 %v407_v22  ;;  %421 = vmatprep.subr.bf16.mxu1 %v407_v22 }
  0x1d   :  { %410 = vmatpush3.bf16.msra.mxu0 %v407_v22  ;;  %429 = vmatpush3.bf16.msra.mxu1 %v407_v22 }
  0x1e   :  { %412 = vmatprep.subr.bf16.mxu0 %v411_v25  ;;  %422 = vmatprep.subr.bf16.mxu1 %v411_v25 }
  0x21   :  { %414 = vmatpush3.bf16.msra.mxu0 %v411_v25  ;;  %430 = vmatpush3.bf16.msra.mxu1 %v411_v25 }
  0x24   :  { %360 = vmatmul.mubr.f32.vlgmr.msra.gmra.mrb[0].mxu0 %v48_v26  ;;  %372 = vmatmul.mubr.f32.vlgmr.msra.gmra.mrb[0].mxu1 %v56_v27 }
  0x25   :  { %362 = vmatprep.mubr.f32.mxu0 %v49_v28  ;;  %374 = vmatprep.mubr.f32.mxu1 %v57_v29 }
  0x28   :  { %363 = vmatmul.mubr.f32.gmra.mrb[2].mxu0 %v50_v30  ;;  %375 = vmatmul.mubr.f32.gmra.mrb[2].mxu1 %v58_v31 }
  0x29   :  { %365 = vmatprep.mubr.f32.mxu0 %v51_v32  ;;  %377 = vmatprep.mubr.f32.mxu1 %v59_v33 }
  0x2c   :  { %366 = vmatmul.mubr.f32.gmra.mrb[4].mxu0 %v52_v34  ;;  %378 = vmatmul.mubr.f32.gmra.mrb[4].mxu1 %v60_v35 }
  0x2d   :  { %368 = vmatprep.mubr.f32.mxu0 %v53_v36  ;;  %380 = vmatprep.mubr.f32.mxu1 %v61_v37 }
  0x30   :  { %369 = vmatmul.mubr.f32.gmra.mrb[6].mxu0 %v54_v38  ;;  %381 = vmatmul.mubr.f32.gmra.mrb[6].mxu1 %v62_v39 }
  0xf7   :  { %v361_v40 = vpop.f32.mrb[0].mxu0  ;;  %v373_v41 = vpop.f32.mrb[0].mxu1 }
  0xf8   :  { %276 = vst [vmem:[%s592_s2 + $0x8] sm:$0xff] %v361_v40  ;;  %284 = vst [vmem:[%s592_s2 + $0x48] sm:$0xff] %v373_v41  ;;  %v145_v42 = vpop.f32.mrb[1].mxu0  ;;  %v185_v43 = vpop.f32.mrb[1].mxu1 }
  0xf9   :  { %275 = vst [vmem:[%s592_s2] sm:$0xff] %v145_v42  ;;  %283 = vst [vmem:[%s592_s2 + $0x40] sm:$0xff] %v185_v43 }
  0xfb   :  { %v364_v44 = vpop.f32.mrb[2].mxu0  ;;  %v376_v45 = vpop.f32.mrb[2].mxu1 }
  0xfc   :  { %278 = vst [vmem:[%s592_s2 + $0x18] sm:$0xff] %v364_v44  ;;  %286 = vst [vmem:[%s592_s2 + $0x58] sm:$0xff] %v376_v45  ;;  %v155_v46 = vpop.f32.mrb[3].mxu0  ;;  %v195_v47 = vpop.f32.mrb[3].mxu1 }
  0xfd   :  { %277 = vst [vmem:[%s592_s2 + $0x10] sm:$0xff] %v155_v46  ;;  %285 = vst [vmem:[%s592_s2 + $0x50] sm:$0xff] %v195_v47 }
  0xff   :  { %v367_v48 = vpop.f32.mrb[4].mxu0  ;;  %v379_v49 = vpop.f32.mrb[4].mxu1 }
 0x100   :  { %280 = vst [vmem:[%s592_s2 + $0x28] sm:$0xff] %v367_v48  ;;  %288 = vst [vmem:[%s592_s2 + $0x68] sm:$0xff] %v379_v49  ;;  %v165_v50 = vpop.f32.mrb[5].mxu0  ;;  %v205_v51 = vpop.f32.mrb[5].mxu1 }
 0x101   :  { %279 = vst [vmem:[%s592_s2 + $0x20] sm:$0xff] %v165_v50  ;;  %287 = vst [vmem:[%s592_s2 + $0x60] sm:$0xff] %v205_v51 }
 0x103   :  { %v370_v52 = vpop.f32.mrb[6].mxu0  ;;  %v382_v53 = vpop.f32.mrb[6].mxu1 }
 0x104   :  { %282 = vst [vmem:[%s592_s2 + $0x38] sm:$0xff] %v370_v52  ;;  %290 = vst [vmem:[%s592_s2 + $0x78] sm:$0xff] %v382_v53  ;;  %v175_v54 = vpop.f32.mrb[7].mxu0  ;;  %v215_v55 = vpop.f32.mrb[7].mxu1 }
 0x105   :  { %281 = vst [vmem:[%s592_s2 + $0x30] sm:$0xff] %v175_v54  ;;  %289 = vst [vmem:[%s592_s2 + $0x70] sm:$0xff] %v215_v55 }

// kernel: _lambda_.20
= control target key start
LH: loop header
LB: loop body
LE: loop exit
PB: predicated region body
PF: predicated region fallthrough
CT: control target
= control target key end

     0   :  { %s431_s12 = smov 0   ;;  %s433_s13 = smov 0   ;;  %s470_s0 = inlined_call_operand.vmem [shape: f32[2,4,64], index: 0, kind: input, shape index: {}]   ;;  %s471_s1 = inlined_call_operand.vmem [shape: f32[2,4,1], index: 1, kind: input, shape index: {}]   ;;  %s472_s2 = inlined_call_operand.vmem [shape: f32[2,4,1], index: 2, kind: input, shape index: {}]   ;;  %s473_s3 = inlined_call_operand.vmem [shape: f32[2,4,64], index: 3, kind: output, shape index: {}]  }
   0x1   :  { %s435_s14 = smov 0  }
   0x2 LB: > { %s25_s15 = sadd.s32 1, %s404_s13  ;;  %p353_p0 = scmp.ge.s32.totalorder %s408_s14, 1  ;;  %s408_s14 = sphi %s435_s14, %s13_s14   ;;  %s404_s13 = sphi %s433_s13, %s475_s13   ;;  %s400_s12 = sphi %s431_s12, %s474_s12  }
   0x3   : > { %p27_p1 = scmp.ge.s32.totalorder %s25_s15, 2  ;;  %p173_p2 = scmp.lt.s32.totalorder %s408_s14, 3 }
   0x5   : > { %s477_s15 = smov (%p27_p1, %s25_s15), 0  ;;  %p174_p3 = pnand %p353_p0, %p173_p2 }
   0x6   : > { %p209_p4 = scmp.lt.s32.totalorder (!%p174_p3), %s400_s12, 1  ;;  %v410_v0 = vmov (!%p174_p3), 0   ;;  %vm249_vm0 = vcmask (!%p174_p3), 519168  }
   0x7   : > { %177 = sbr.rel (%p174_p3) target bundleno = 156 (0x9c), region = 32  ;;  %385 = vset.pattern.permute.xlu0 (!%p174_p3), %v410_v0 }
   0xe   : > { %s479_s12 = smov (!%p209_p4, %s400_s12), 1 }
   0xf   : > { %s354_s16 = sshll.u32 %s479_s12, 2 }
  0x10   : > { %s219_s19 = scalar_lea.vmem %s471_s1, %s354_s16  ;;  %s223_s22 = scalar_lea.vmem %s472_s2, %s354_s16 }
  0x11   : > { %v232_v1 = vld [vmem:[%s219_s19] sm:$0xf]  ;;  %s215_s25 = scalar_lea.vmem %s470_s0, %s354_s16  ;;  %s230_s28 = scalar_lea.vmem %s473_s3, %s354_s16 }
  0x12   : > { %235 = vperm.xlu0 %385, %v232_v1   ;;  %v239_v2 = vld [vmem:[%s223_s22] sm:$0xf] }
  0x13   : > { %v231_v4 = vld [vmem:[%s215_s25] sm:$0xf] }
  0x16   : > { %242 = vperm.xlu0 %385, %v239_v2  }
  0x91   : > { %v236_v3 = vpop.permute.xlu0 %235 }
  0x92   : > { %v238_v5 = vmul.f32 %v236_v3, %v231_v4 }
  0x95   : > { %v243_v6 = vpop.permute.xlu0 %242 }
  0x96   : > { %v245_v7 = vadd.f32 %v243_v6, %v238_v5 }
  0x98   : > { %vm246_vm1 = vcmp.ge.f32.partialorder %v245_v7, 0.0  ;;  %v247_v8 = vmul.f32 0.25, %v245_v7 }
  0x9a   : > { %v248_v9 = vsel %vm246_vm1, %v245_v7, %v247_v8 }
  0x9b   : > { %250 = vst.msk [vmem:[%s230_s28] sm:$0xf] %vm249_vm0, %v248_v9 }
  0x9c PF: > { %s13_s14 = sadd.s32 1, %s408_s14   ;;  %s474_s12 = smov %s404_s13 }
  0x9d   : > { %p10_p5 = scmp.ge.s32.totalorder %s13_s14, 4   ;;  %s475_s13 = smov %s477_s15 }
  0x9f   :  { %12 = sbr.rel (!%p10_p5) target bundleno = 2 (0x2), region = 68 }

// kernel: _lambda_.21
= control target key start
LH: loop header
LB: loop body
LE: loop exit
PB: predicated region body
PF: predicated region fallthrough
CT: control target
= control target key end

     0   :  { %s428_s12 = smov 0   ;;  %s430_s13 = smov 0   ;;  %s464_s0 = inlined_call_operand.vmem [shape: f32[2,4,64], index: 0, kind: input, shape index: {}]   ;;  %s465_s1 = inlined_call_operand.vmem [shape: f32[2,4,1], index: 1, kind: input, shape index: {}]   ;;  %s466_s2 = inlined_call_operand.vmem [shape: f32[2,4,1], index: 2, kind: input, shape index: {}]   ;;  %s467_s3 = inlined_call_operand.vmem [shape: f32[2,4,64], index: 3, kind: output, shape index: {}]  }
   0x1   :  { %s432_s14 = smov 0  }
   0x2 LB: > { %s25_s15 = sadd.s32 1, %s401_s13  ;;  %p350_p0 = scmp.ge.s32.totalorder %s405_s14, 1  ;;  %s405_s14 = sphi %s432_s14, %s13_s14   ;;  %s401_s13 = sphi %s430_s13, %s469_s13   ;;  %s397_s12 = sphi %s428_s12, %s468_s12  }
   0x3   : > { %p27_p1 = scmp.ge.s32.totalorder %s25_s15, 2  ;;  %p173_p2 = scmp.lt.s32.totalorder %s405_s14, 3 }
   0x5   : > { %s471_s15 = smov (%p27_p1, %s25_s15), 0  ;;  %p174_p3 = pnand %p350_p0, %p173_p2 }
   0x6   : > { %p209_p4 = scmp.lt.s32.totalorder (!%p174_p3), %s397_s12, 1  ;;  %v407_v0 = vmov (!%p174_p3), 0   ;;  %vm246_vm0 = vcmask (!%p174_p3), 519168  }
   0x7   : > { %177 = sbr.rel (%p174_p3) target bundleno = 153 (0x99), region = 32  ;;  %382 = vset.pattern.permute.xlu0 (!%p174_p3), %v407_v0 }
   0xe   : > { %s473_s12 = smov (!%p209_p4, %s397_s12), 1 }
   0xf   : > { %s351_s16 = sshll.u32 %s473_s12, 2 }
  0x10   : > { %s219_s19 = scalar_lea.vmem %s465_s1, %s351_s16  ;;  %s223_s22 = scalar_lea.vmem %s466_s2, %s351_s16 }
  0x11   : > { %v232_v1 = vld [vmem:[%s219_s19] sm:$0xf]  ;;  %s215_s25 = scalar_lea.vmem %s464_s0, %s351_s16  ;;  %s230_s28 = scalar_lea.vmem %s467_s3, %s351_s16 }
  0x12   : > { %235 = vperm.xlu0 %382, %v232_v1   ;;  %v239_v2 = vld [vmem:[%s223_s22] sm:$0xf] }
  0x13   : > { %v231_v4 = vld [vmem:[%s215_s25] sm:$0xf] }
  0x16   : > { %242 = vperm.xlu0 %382, %v239_v2  }
  0x91   : > { %v236_v3 = vpop.permute.xlu0 %235 }
  0x92   : > { %v238_v5 = vmul.f32 %v236_v3, %v231_v4 }
  0x95   : > { %v243_v6 = vpop.permute.xlu0 %242 }
  0x96   : > { %v245_v7 = vadd.f32 %v243_v6, %v238_v5 }
  0x98   : > { %247 = vst.msk [vmem:[%s230_s28] sm:$0xf] %vm246_vm0, %v245_v7 }
  0x99 PF: > { %s13_s14 = sadd.s32 1, %s405_s14   ;;  %s468_s12 = smov %s401_s13 }
  0x9a   : > { %p10_p5 = scmp.ge.s32.totalorder %s13_s14, 4   ;;  %s469_s13 = smov %s471_s15 }
  0x9c   :  { %12 = sbr.rel (!%p10_p5) target bundleno = 2 (0x2), region = 68 }

</bundles_post_ra>
